<compile_context>
chip_gen: v7x
topology: tpu7x:2x2x1
jax: 0.10.0
libtpu: 0.0.40
codegen_flags: <defaults>
</compile_context>

<pallas_src>
import math

import jax
import jax.numpy as jnp
from jax import lax
from jax.experimental import pallas as pl
from jax.experimental.pallas import tpu as pltpu

N_EMBD = 64        # n_embd in the PyTorch module
DROPOUT_P = 0.4    # dropout in the PyTorch module


def _make_mha_kernel(num_heads: int, head_size: int, dropout_p: float, training: bool):
    """One grid step = one batch element: fused QKV proj + causal softmax(+dropout)
    + PV + output projection (+bias, +dropout), all heads batched."""

    NH, H = num_heads, head_size
    NHH = NH * H
    apply_dropout = training and dropout_p > 0.0
    inv_keep = 1.0 / (1.0 - dropout_p) if dropout_p < 1.0 else 0.0
    scale = 1.0 / math.sqrt(H)   # SDPA default: 1/sqrt(E), E = head_size

    def body(x_ref, wqkv_ref, wproj_ref, bproj_ref, kattn_ref, kout_ref, o_ref):
        T, C = x_ref.shape[1], x_ref.shape[2]

        # ---- fused QKV projection for all heads (bf16 operands on the MXU) ----
        x_bf = x_ref[0].astype(jnp.bfloat16)                          # (T, C)
        qkv = jnp.dot(x_bf, wqkv_ref[...].astype(jnp.bfloat16),
                      preferred_element_type=jnp.float32)             # (T, 3*NH*H) f32

        # one wide (64-lane) slice per tensor — NOT per head — then split head axis
        q = qkv[:, 0 * NHH:1 * NHH].reshape(T, NH, H)
        k = qkv[:, 1 * NHH:2 * NHH].reshape(T, NH, H)
        v = qkv[:, 2 * NHH:3 * NHH].reshape(T, NH, H)

        qb = q.astype(jnp.bfloat16)
        kb = k.astype(jnp.bfloat16)
        vb = v.astype(jnp.bfloat16)

        # ---- all-head scores in ONE batched contraction (batch dim = h) ----
        s = jnp.einsum('qhd,khd->hqk', qb, kb,
                       preferred_element_type=jnp.float32) * scale    # (NH, T, T) f32

        row = lax.broadcasted_iota(jnp.int32, (T, T), 0)
        col = lax.broadcasted_iota(jnp.int32, (T, T), 1)
        s = jnp.where((row >= col)[None, :, :], s, -1e30)             # causal mask

        # ---- softmax in f32 (exp on EUP, approx reciprocal on EUP) ----
        m = jnp.max(s, axis=-1, keepdims=True)
        p = jnp.exp(s - m)
        denom = jnp.sum(p, axis=-1, keepdims=True)

        if apply_dropout:
            # fold the 1/(1-p) survivor scale into the approx reciprocal
            probs = p * pl.reciprocal(denom * (1.0 - dropout_p), approx=True)
            probs = jnp.where(kattn_ref[0] != 0, probs, 0.0)          # (NH, T, T)
        else:
            probs = p * pl.reciprocal(denom, approx=True)

        # ---- probs @ V for all heads in ONE batched contraction ----
        oh = jnp.einsum('hqk,khd->qhd', probs.astype(jnp.bfloat16), vb,
                        preferred_element_type=jnp.float32)           # (T, NH, H) f32

        # ---- single output projection (K = NH*H) + bias ----
        y = jnp.dot(oh.reshape(T, NHH).astype(jnp.bfloat16),
                    wproj_ref[...].astype(jnp.bfloat16),
                    preferred_element_type=jnp.float32)               # (T, C) f32
        y = y + bproj_ref[...]

        if apply_dropout:
            y = jnp.where(kout_ref[0] != 0, y * inv_keep, 0.0)

        o_ref[...] = y[None, :, :].astype(o_ref.dtype)

    if apply_dropout:
        def train_kernel(x_ref, wqkv_ref, wproj_ref, bproj_ref, kattn_ref, kout_ref, o_ref):
            body(x_ref, wqkv_ref, wproj_ref, bproj_ref, kattn_ref, kout_ref, o_ref)
        return train_kernel

    def eval_kernel(x_ref, wqkv_ref, wproj_ref, bproj_ref, o_ref):
        body(x_ref, wqkv_ref, wproj_ref, bproj_ref, None, None, o_ref)
    return eval_kernel


def multi_head_attention(x, w_qkv, w_proj, b_proj, dropout_key=None, *,
                         num_heads, head_size, dropout_p=DROPOUT_P, training=True):
    """x: (B,T,C) f32; w_qkv: (C, 3*NH*H); w_proj: (NH*H, C); b_proj: (1, C) -> (B,T,C)."""
    B, T, C = x.shape
    NHH = num_heads * head_size
    assert w_qkv.shape == (C, 3 * NHH)
    assert w_proj.shape == (NHH, C)
    assert b_proj.shape == (1, C)

    apply_dropout = training and dropout_p > 0.0

    # per-batch block for activations, constant (not re-copied) blocks for weights
    x_spec = pl.BlockSpec((1, T, C), lambda b: (b, 0, 0))
    wqkv_spec = pl.BlockSpec((C, 3 * NHH), lambda b: (0, 0))
    wproj_spec = pl.BlockSpec((NHH, C), lambda b: (0, 0))
    bproj_spec = pl.BlockSpec((1, C), lambda b: (0, 0))
    out_spec = pl.BlockSpec((1, T, C), lambda b: (b, 0, 0))

    if apply_dropout:
        assert dropout_key is not None
        # packed uint8 keep-masks (same distribution as torch dropout; bit stream differs)
        k_attn, k_out = jax.random.split(dropout_key)
        keep_attn = jax.random.bernoulli(
            k_attn, 1.0 - dropout_p, (B, num_heads, T, T)).astype(jnp.uint8)
        keep_out = jax.random.bernoulli(
            k_out, 1.0 - dropout_p, (B, T, C)).astype(jnp.uint8)
        operands = (x, w_qkv, w_proj, b_proj, keep_attn, keep_out)
        in_specs = [x_spec, wqkv_spec, wproj_spec, bproj_spec,
                    pl.BlockSpec((1, num_heads, T, T), lambda b: (b, 0, 0, 0)),
                    pl.BlockSpec((1, T, C), lambda b: (b, 0, 0))]
        mask_bytes = keep_attn.size + keep_out.size
    else:
        # eval path: no dropout inputs generated, DMA'd or read at all
        operands = (x, w_qkv, w_proj, b_proj)
        in_specs = [x_spec, wqkv_spec, wproj_spec, bproj_spec]
        mask_bytes = 0

    flops = (2 * B * T * C * (3 * NHH)                      # fused QKV projection
             + 4 * B * num_heads * T * T * head_size        # scores + probs @ V
             + 2 * B * T * NHH * C)                         # output projection
    cost = pl.CostEstimate(
        flops=flops,
        transcendentals=B * num_heads * T * T,              # exp in softmax
        bytes_accessed=4 * (x.size + w_qkv.size + w_proj.size + b_proj.size + B * T * C)
                       + mask_bytes,
    )

    return pl.pallas_call(
        _make_mha_kernel(num_heads, head_size, float(dropout_p), bool(training)),
        out_shape=jax.ShapeDtypeStruct((B, T, C), jnp.float32),
        grid=(B,),
        in_specs=in_specs,
        out_specs=out_spec,
        compiler_params=pltpu.CompilerParams(
            dimension_semantics=("parallel",),               # shard batch across cores
            vmem_limit_bytes=32 * 1024 * 1024),              # explicit scoped-VMEM limit
        cost_estimate=cost,
    )(*operands)


def _mha_reference(x, w_qkv, w_proj, b_proj, num_heads, head_size):
    """Pure-JAX f32 reference (eval mode, no dropout) for correctness checking."""
    B, T, C = x.shape
    NHH = num_heads * head_size
    qkv = x.reshape(B * T, C) @ w_qkv
    q, k, v = qkv[:, :NHH], qkv[:, NHH:2 * NHH], qkv[:, 2 * NHH:]
    q = q.reshape(B, T, num_heads, head_size).transpose(0, 2, 1, 3)
    k = k.reshape(B, T, num_heads, head_size).transpose(0, 2, 1, 3)
    v = v.reshape(B, T, num_heads, head_size).transpose(0, 2, 1, 3)
    s = jnp.einsum('bhqd,bhkd->bhqk', q, k) / math.sqrt(head_size)
    mask = jnp.tril(jnp.ones((T, T), dtype=bool))
    s = jnp.where(mask, s, -jnp.inf)
    p = jax.nn.softmax(s, axis=-1)
    o = jnp.einsum('bhqk,bhkd->bhqd', p, v)
    o = o.transpose(0, 2, 1, 3).reshape(B * T, NHH)
    return (o @ w_proj + b_proj).reshape(B, T, C)


if __name__ == "__main__":
    # Small shapes consistent with the module: B=2, T=16 (<= block_size=128),
    # C = n_embd = 64, num_heads=4, head_size=16 (num_heads*head_size = n_embd).
    B, T, C = 2, 16, N_EMBD
    NUM_HEADS, HEAD_SIZE = 4, 16
    NHH = NUM_HEADS * HEAD_SIZE

    key = jax.random.PRNGKey(0)
    kx, kqkv, kwp, kbp, kdrop = jax.random.split(key, 5)

    x = jax.random.normal(kx, (B, T, C), dtype=jnp.float32)

    # nn.Linear(n_embd, head_size, bias=False) per head: init U(-1/sqrt(n_embd), ...);
    # all heads' Q/K/V weights packed as one (C, 3*NH*H) matrix (stored for x @ W).
    bound_in = 1.0 / math.sqrt(C)
    w_qkv = jax.random.uniform(kqkv, (C, 3 * NHH), jnp.float32, -bound_in, bound_in)

    # nn.Linear(num_heads*head_size, n_embd): weight+bias init U(-1/sqrt(NH*H), ...).
    bound_p = 1.0 / math.sqrt(NHH)
    w_proj = jax.random.uniform(kwp, (NHH, C), jnp.float32, -bound_p, bound_p)
    b_proj = jax.random.uniform(kbp, (1, C), jnp.float32, -bound_p, bound_p)

    # Correctness check in eval mode (no dropout) against a pure-f32 JAX reference.
    # Tolerance 3e-2: MXU operands are deliberately bf16 (per perf review) with f32
    # accumulation, plus the ~1e-3-relative approx reciprocal in the softmax.
    out_eval = multi_head_attention(x, w_qkv, w_proj, b_proj,
                                    num_heads=NUM_HEADS, head_size=HEAD_SIZE,
                                    dropout_p=DROPOUT_P, training=False)
    out_eval = jax.block_until_ready(out_eval)
    ref = _mha_reference(x, w_qkv, w_proj, b_proj, NUM_HEADS, HEAD_SIZE)
    max_err = float(jnp.max(jnp.abs(out_eval - ref)))
    assert max_err < 3e-2, f"eval-mode mismatch vs reference: {max_err}"

    # Train-mode run (dropout on attention probs and on the projected output).
    out = multi_head_attention(x, w_qkv, w_proj, b_proj, kdrop,
                               num_heads=NUM_HEADS, head_size=HEAD_SIZE,
                               dropout_p=DROPOUT_P, training=True)
    out = jax.block_until_ready(out)
    assert out.shape == (B, T, C)
    assert bool(jnp.all(jnp.isfinite(out)))
    print("KERNEL_OK")
</pallas_src>

<mosaic_0001>
module attributes {stable_mosaic.version = 11 : i64} {
  func.func @eval_kernel(%arg0: i32, %arg1: memref<1x16x64xf32, #tpu.memory_space<vmem>>, %arg2: memref<64x192xf32, #tpu.memory_space<vmem>>, %arg3: memref<64x64xf32, #tpu.memory_space<vmem>>, %arg4: memref<1x64xf32, #tpu.memory_space<vmem>>, %arg5: memref<1x16x64xf32, #tpu.memory_space<vmem>>) attributes {dimension_semantics = [#tpu.dimension_semantics<parallel>], iteration_bounds = array<i64: 2>, scalar_prefetch = 0 : i64, scratch_operands = 0 : i64, tpu.core_type = #tpu.core_type<tc>, window_params = [{transform_indices = @transform_0, window_bounds = array<i64: 1, 16, 64>}, {pipeline_mode = #tpu.pipeline_mode<synchronous>, transform_indices = @transform_1, window_bounds = array<i64: 64, 192>}, {pipeline_mode = #tpu.pipeline_mode<synchronous>, transform_indices = @transform_2, window_bounds = array<i64: 64, 64>}, {pipeline_mode = #tpu.pipeline_mode<synchronous>, transform_indices = @transform_3, window_bounds = array<i64: 1, 64>}, {transform_indices = @transform_4, window_bounds = array<i64: 1, 16, 64>}]} {
    %c0 = arith.constant 0 : index
    %c0_0 = arith.constant 0 : index
    %c0_1 = arith.constant 0 : index
    %0 = vector.load %arg1[%c0, %c0_0, %c0_1] : memref<1x16x64xf32, #tpu.memory_space<vmem>>, vector<1x16x64xf32>
    %1 = vector.shape_cast %0 : vector<1x16x64xf32> to vector<16x64xf32>
    %2 = arith.truncf %1 : vector<16x64xf32> to vector<16x64xbf16>
    %c0_2 = arith.constant 0 : index
    %c0_3 = arith.constant 0 : index
    %3 = vector.load %arg2[%c0_2, %c0_3] : memref<64x192xf32, #tpu.memory_space<vmem>>, vector<64x192xf32>
    %4 = arith.truncf %3 : vector<64x192xf32> to vector<64x192xbf16>
    %cst = arith.constant dense<0.000000e+00> : vector<16x192xf32>
    %5 = tpu.matmul %2, %4, %cst {dimension_numbers = #tpu.dot_dimension_numbers<[1], [0], [0], [1], [0, 0, 1, 1], [], []>} : vector<16x64xbf16>, vector<64x192xbf16>, vector<16x192xf32> -> vector<16x192xf32>
    %6 = vector.extract_strided_slice %5 {offsets = [0, 0], sizes = [16, 64], strides = [1, 1]} : vector<16x192xf32> to vector<16x64xf32>
    %7 = vector.shape_cast %6 : vector<16x64xf32> to vector<16x4x16xf32>
    %8 = vector.extract_strided_slice %5 {offsets = [0, 64], sizes = [16, 64], strides = [1, 1]} : vector<16x192xf32> to vector<16x64xf32>
    %9 = vector.shape_cast %8 : vector<16x64xf32> to vector<16x4x16xf32>
    %10 = vector.extract_strided_slice %5 {offsets = [0, 128], sizes = [16, 64], strides = [1, 1]} : vector<16x192xf32> to vector<16x64xf32>
    %11 = vector.shape_cast %10 : vector<16x64xf32> to vector<16x4x16xf32>
    %12 = arith.truncf %7 : vector<16x4x16xf32> to vector<16x4x16xbf16>
    %13 = arith.truncf %9 : vector<16x4x16xf32> to vector<16x4x16xbf16>
    %14 = arith.truncf %11 : vector<16x4x16xf32> to vector<16x4x16xbf16>
    "tpu.trace_start"() <{level = 10 : i32, message = "qhd,khd->hqk"}> : () -> ()
    %cst_4 = arith.constant dense<0.000000e+00> : vector<4x16x16xf32>
    %15 = tpu.matmul %12, %13, %cst_4 {dimension_numbers = #tpu.dot_dimension_numbers<[2], [2], [0], [0], [0, 1, 0, 0, 1, 0], [1], [1]>} : vector<16x4x16xbf16>, vector<16x4x16xbf16>, vector<4x16x16xf32> -> vector<4x16x16xf32>
    "tpu.trace_stop"() : () -> ()
    %cst_5 = arith.constant 2.500000e-01 : f32
    %16 = vector.broadcast %cst_5 : f32 to vector<4x16x16xf32>
    %17 = arith.mulf %15, %16 : vector<4x16x16xf32>
    %18 = tpu.iota {dimensions = array<i32: 0>} : vector<16x16xi32>
    %19 = tpu.iota {dimensions = array<i32: 1>} : vector<16x16xi32>
    %20 = arith.cmpi sge, %18, %19 : vector<16x16xi32>
    %21 = vector.shape_cast %20 : vector<16x16xi1> to vector<1x16x16xi1>
    %cst_6 = arith.constant -1.000000e+30 : f32
    %22 = vector.shape_cast %21 : vector<1x16x16xi1> to vector<1x16x16xi1>
    %23 = vector.broadcast %22 : vector<1x16x16xi1> to vector<4x16x16xi1>
    %24 = vector.broadcast %cst_6 : f32 to vector<4x16x16xf32>
    %25 = arith.select %23, %17, %24 : vector<4x16x16xi1>, vector<4x16x16xf32>
    %cst_7 = arith.constant dense<0xFF800000> : vector<4x16xf32>
    %26 = vector.multi_reduction <maximumf>, %25, %cst_7 [2] : vector<4x16x16xf32> to vector<4x16xf32>
    %27 = vector.shape_cast %26 : vector<4x16xf32> to vector<4x16x1xf32>
    %28 = vector.broadcast %27 : vector<4x16x1xf32> to vector<4x16x16xf32>
    %29 = arith.subf %25, %28 : vector<4x16x16xf32>
    %30 = math.exp %29 : vector<4x16x16xf32>
    %cst_8 = arith.constant dense<0.000000e+00> : vector<4x16xf32>
    %31 = vector.multi_reduction <add>, %30, %cst_8 [2] : vector<4x16x16xf32> to vector<4x16xf32>
    %32 = vector.shape_cast %31 : vector<4x16xf32> to vector<4x16x1xf32>
    %33 = tpu.reciprocal %32 {approx = true} : vector<4x16x1xf32> -> vector<4x16x1xf32>
    %34 = vector.broadcast %33 : vector<4x16x1xf32> to vector<4x16x16xf32>
    %35 = arith.mulf %30, %34 : vector<4x16x16xf32>
    %36 = arith.truncf %35 : vector<4x16x16xf32> to vector<4x16x16xbf16>
    "tpu.trace_start"() <{level = 10 : i32, message = "hqk,khd->qhd"}> : () -> ()
    %cst_9 = arith.constant dense<0.000000e+00> : vector<4x16x16xf32>
    %37 = tpu.matmul %14, %36, %cst_9 {dimension_numbers = #tpu.dot_dimension_numbers<[0], [2], [2], [1], [0, 1, 0, 2, 1, 1], [1], [0]>} : vector<16x4x16xbf16>, vector<4x16x16xbf16>, vector<4x16x16xf32> -> vector<4x16x16xf32>
    %38 = tpu.transpose %37, [2, 0, 1] : vector<4x16x16xf32> -> vector<16x4x16xf32>
    "tpu.trace_stop"() : () -> ()
    %39 = vector.shape_cast %38 : vector<16x4x16xf32> to vector<16x64xf32>
    %40 = arith.truncf %39 : vector<16x64xf32> to vector<16x64xbf16>
    %c0_10 = arith.constant 0 : index
    %c0_11 = arith.constant 0 : index
    %41 = vector.load %arg3[%c0_10, %c0_11] : memref<64x64xf32, #tpu.memory_space<vmem>>, vector<64x64xf32>
    %42 = arith.truncf %41 : vector<64x64xf32> to vector<64x64xbf16>
    %cst_12 = arith.constant dense<0.000000e+00> : vector<16x64xf32>
    %43 = tpu.matmul %40, %42, %cst_12 {dimension_numbers = #tpu.dot_dimension_numbers<[1], [0], [0], [1], [0, 0, 1, 1], [], []>} : vector<16x64xbf16>, vector<64x64xbf16>, vector<16x64xf32> -> vector<16x64xf32>
    %c0_13 = arith.constant 0 : index
    %c0_14 = arith.constant 0 : index
    %44 = vector.load %arg4[%c0_13, %c0_14] : memref<1x64xf32, #tpu.memory_space<vmem>>, vector<1x64xf32>
    %45 = vector.broadcast %44 : vector<1x64xf32> to vector<16x64xf32>
    %46 = arith.addf %43, %45 : vector<16x64xf32>
    %47 = vector.shape_cast %46 : vector<16x64xf32> to vector<1x16x64xf32>
    %c0_15 = arith.constant 0 : index
    %c0_16 = arith.constant 0 : index
    %c0_17 = arith.constant 0 : index
    %48 = vector.load %arg5[%c0_15, %c0_16, %c0_17] : memref<1x16x64xf32, #tpu.memory_space<vmem>>, vector<1x16x64xf32>
    tpu.vector_store %arg5[%c0_15, %c0_16, %c0_17], %47 {strides = array<i32>} : memref<1x16x64xf32, #tpu.memory_space<vmem>>, vector<1x16x64xf32>,
    return
  }
  func.func @transform_0(%arg0: i32) -> (i32, i32, i32) {
    %c0_i32 = arith.constant 0 : i32
    %c0_i32_0 = arith.constant 0 : i32
    %c0_i32_1 = arith.constant 0 : i32
    return %arg0, %c0_i32, %c0_i32_0 : i32, i32, i32
  }
  func.func @transform_1(%arg0: i32) -> (i32, i32) {
    %c0_i32 = arith.constant 0 : i32
    %c0_i32_0 = arith.constant 0 : i32
    %c0_i32_1 = arith.constant 0 : i32
    return %c0_i32, %c0_i32_0 : i32, i32
  }
  func.func @transform_2(%arg0: i32) -> (i32, i32) {
    %c0_i32 = arith.constant 0 : i32
    %c0_i32_0 = arith.constant 0 : i32
    %c0_i32_1 = arith.constant 0 : i32
    return %c0_i32, %c0_i32_0 : i32, i32
  }
  func.func @transform_3(%arg0: i32) -> (i32, i32) {
    %c0_i32 = arith.constant 0 : i32
    %c0_i32_0 = arith.constant 0 : i32
    %c0_i32_1 = arith.constant 0 : i32
    return %c0_i32, %c0_i32_0 : i32, i32
  }
  func.func @transform_4(%arg0: i32) -> (i32, i32, i32) {
    %c0_i32 = arith.constant 0 : i32
    %c0_i32_0 = arith.constant 0 : i32
    %c0_i32_1 = arith.constant 0 : i32
    return %arg0, %c0_i32, %c0_i32_0 : i32, i32, i32
  }
}

</mosaic_0001>

<bundles_post_ra>
// kernel: tpu_custom_call.1
= control target key start
LH: loop header
LB: loop body
LE: loop exit
PB: predicated region body
PF: predicated region fallthrough
CT: control target
= control target key end

     0   :  { %9 = vsyncpa [#allocation3], 0  ;;  %s5156_s0 = inlined_call_operand.hbm [shape: f32[2,16,64], index: 0, kind: input, shape index: {}]   ;;  %s5157_s1 = inlined_call_operand.hbm [shape: f32[64,192], index: 1, kind: input, shape index: {}]   ;;  %s5158_s2 = inlined_call_operand.hbm [shape: f32[64,64], index: 2, kind: input, shape index: {}]   ;;  %s5159_s3 = inlined_call_operand.vmem [shape: f32[1,64], index: 3, kind: input, shape index: {}]   ;;  %s5160_s4 = inlined_call_operand.hbm [shape: f32[2,16,64], index: 4, kind: output, shape index: {}]  }
   0x1   :  { %11 = vsyncpa [#allocation3 + $0x1], 0 }
   0x2   :  { %12 = vsyncpa [#allocation6], 0 }
   0x3   :  { %13 = vsyncpa [#allocation4], 0 }
   0x4   :  { %15 = vsyncpa [#allocation4 + $0x1], 0  ;;  %s4425_s15 = smov 0   ;;  %s4427_s16 = smov 0  }
   0x5   :  { %s4429_s17 = smov 0   ;;  %s4431_s18 = smov 0  }
   0x6 LB: > { %s4446_s19 = sadd.s32 4294967295, %s4376_s18   ;;  %s3964_s20 = sadd.s32 4294967294, %s4376_s18   ;;  %s4376_s18 = sphi %s4431_s18, %s5180_s18   ;;  %s4372_s17 = sphi %s4429_s17, %s5179_s17   ;;  %s4368_s16 = sphi %s4427_s16, %s5178_s16   ;;  %s4364_s15 = sphi %s4425_s15, %s5177_s15  }
   0x7   : > { %p41_p0 = scmp.ne.s32.totalorder %s4368_s16, %s4364_s15  ;;  %p5161_p1 = scmp.eq.s32.totalorder %s4446_s19, 0 }
   0x8   : > { %p134_p3 = scmp.eq.s32.totalorder %s3964_s20, 1  ;;  %p3965_p5 = scmp.ge.s32.totalorder %s4376_s18, 1 }
   0x9   : > { %p4455_p4 = por %p5161_p1, %p41_p0  ;;  %p141_p7 = scmp.lt.s32.totalorder %s4376_s18, 3 }
   0xa   : > { %p4460_p6 = por %p134_p3, %p41_p0  ;;  %s4378_s24 = smov [#allocation5]  }
   0xb   : > { %s5164_s21 = scalar_select %p4455_p4, 1, 0 }
   0xc   : > { %s5165_s22 = scalar_select %p4460_p6, 1, 0 }
   0xd   : > { %p4465_p8 = pnand %p3965_p5, %p141_p7  ;;  %s153_s25 = sshll.u32 %s4378_s24, 4  ;;  %s4469_s25 = int_to_ptr.vmem [resolvable:$true] %s153_s25 }
   0xe   : > { %s4379_s27 = smov [#allocation7]   ;;  %s4220_s5 = scalar_lea.hbm %s5157_s1, 2048 }
   0xf   : > { %p4100_p9 = pneg %p4465_p8  ;;  %s166_s28 = sshll.u32 %s4379_s27, 4  ;;  %s4480_s28 = int_to_ptr.vmem [resolvable:$true] %s166_s28 }
  0x10   : > { %p4221_p12 = scmp.ne.s32.totalorder %s5157_s1, %s4220_s5  ;;  %p4227_p5 = scmp.lt.u32.totalorder %s4220_s5, %s5157_s1 }
  0x11   : > { %p4476_p11 = pnand %p4100_p9, %p5161_p1 }
  0x13   : > { %p4222_p13 = pneg %p4476_p11 }
  0x15   : > { %p4223_p0 = pnand %p4222_p13, %p4221_p12 }
  0x17   : > { %p4224_p3 = pneg %p4223_p0 }
  0x19   : > { %p4229_p7 = pnand %p4227_p5, %p4224_p3 }
  0x1b   : > { %4232 = shalt.err (!%p4229_p7)
}
  0x1c   : > { %s4233_s10 = scalar_lea.vmem %s4469_s25, 2048  ;;  %p4241_p2 = scmp.lt.s32.totalorder %s4469_s25, %s4469_s25 }
  0x1d   : > { %p4234_p9 = scmp.ne.s32.totalorder %s4469_s25, %s4233_s10  ;;  %p4242_p12 = scmp.lt.s32.totalorder %s4233_s10, %s4233_s10 }
  0x1f   : > { %p4236_p10 = pnand %p4234_p9, %p4222_p13  ;;  %p4243_p0 = por %p4242_p12, %p4241_p2 }
  0x21   : > { %p4237_p1 = pneg %p4236_p10 }
  0x23   : > { %p4244_p6 = pnand %p4243_p0, %p4237_p1 }
  0x25   : > { %4247 = shalt.err (!%p4244_p6)
}
  0x26   : > { %s4380_s11 = smov 256   ;;  %s4381_s12 = smov 16  }
  0x27   : > { %4103 = dma.hbm_to_vmem [thread:$0]  (!%p4476_p11), %s5157_s1, 2048, %s4469_s25, [#allocation6], %s4380_s11, %s4380_s11, %s4381_s12  }
  0x28   : > { %s4248_s27 = scalar_lea.hbm %s5158_s2, 1024 }
  0x29   : > { %p4249_p2 = scmp.ne.s32.totalorder %s5158_s2, %s4248_s27  ;;  %p4255_p10 = scmp.lt.u32.totalorder %s4248_s27, %s5158_s2 }
  0x2b   : > { %p4251_p1 = pnand %p4249_p2, %p4222_p13 }
  0x2d   : > { %p4252_p6 = pneg %p4251_p1 }
  0x2f   : > { %p4257_p3 = pnand %p4255_p10, %p4252_p6 }
  0x31   : > { %4260 = shalt.err (!%p4257_p3)
}
  0x32   : > { %s4261_s25 = scalar_lea.vmem %s4480_s28, 1024  ;;  %p4269_p12 = scmp.lt.s32.totalorder %s4480_s28, %s4480_s28 }
  0x33   : > { %p4262_p5 = scmp.ne.s32.totalorder %s4480_s28, %s4261_s25  ;;  %p4270_p0 = scmp.lt.s32.totalorder %s4261_s25, %s4261_s25 }
  0x35   : > { %p4264_p7 = pnand %p4262_p5, %p4222_p13  ;;  %p4271_p2 = por %p4270_p0, %p4269_p12 }
  0x37   : > { %p4265_p9 = pneg %p4264_p7 }
  0x39   : > { %p4272_p1 = pnand %p4271_p2, %p4265_p9 }
  0x3b   : > { %4275 = shalt.err (!%p4272_p1)
}
  0x3c   : > { %s4382_s7 = smov 128   ;;  %s4383_s8 = smov 8  }
  0x3d   : > { %4106 = dma.hbm_to_vmem [thread:$0]  (!%p4476_p11), %s5158_s2, 1024, %s4480_s28, [#allocation6], %s4382_s7, %s4382_s7, %s4383_s8  }
  0x3e   : > { %s4538_s11 = sadd.s32 1, %s4376_s18   ;;  %s28_s13 = sadd.s32 1, %s4372_s17 }
  0x3f   : > { %s25_s12 = ssub.s32 %s4376_s18, %s4538_s11  ;;  %p35_p6 = scmp.ne.s32.totalorder %s4372_s17, %s4368_s16 }
  0x40   : > { %p26_p13 = scmp.eq.s32.totalorder %s25_s12, 0  ;;  %p36_p10 = scmp.eq.s32.totalorder %s4376_s18, 0 }
  0x41   : > { %p5168_p5 = scmp.eq.s32.totalorder %s4446_s19, 1  ;;  %p4117_p9 = scmp.lt.s32.totalorder %s4376_s18, 2 }
  0x42   : > { %s4547_s14 = scalar_select %p26_p13, %s4372_s17, %s28_s13  }
  0x43   : > { %p37_p3 = por %p36_p10, %p35_p6  ;;  %p4551_p7 = por %p5168_p5, %p35_p6 }
  0x44   : > { %s183_s20 = sand.u32 1, %s4372_s17   ;;  %s4005_s28 = sshll.u32 %s4376_s18, 8 }
  0x45   : > { %s5169_s26 = scalar_select %p4551_p7, 1, 0 }
  0x46   : > { %s3969_s24 = sshll.u32 %s183_s20, 4  ;;  %s4561_s30 = scalar_lea.hbm %s5156_s0, %s4005_s28 }
  0x47   : > { %s187_s5 = scalar_lea.vmem [#allocation2], %s3969_s24  ;;  %p4565_p11 = pnand %p4117_p9, %p37_p3 }
  0x48   : > { %s194_s6 = sshll.u32 %s187_s5, 4  ;;  %s4569_s9 = scalar_lea.sflag [#allocation3], %s183_s20  ;;  %s4563_s6 = int_to_ptr.vmem [resolvable:$true] %s194_s6 }
  0x49   : > { %s4276_s10 = scalar_lea.hbm %s4561_s30, 256  ;;  %p4278_p0 = pneg %p4565_p11 }
  0x4a   : > { %p4277_p12 = scmp.ne.s32.totalorder %s4561_s30, %s4276_s10  ;;  %s4281_s24 = scalar_lea.hbm %s5156_s0, 512 }
  0x4b   : > { %p4282_p13 = scmp.lt.u32.totalorder %s4561_s30, %s5156_s0  ;;  %p4283_p6 = scmp.lt.u32.totalorder %s4281_s24, %s4276_s10 }
  0x4c   : > { %p4279_p2 = pnand %p4278_p0, %p4277_p12  ;;  %p4285_p3 = scmp.lt.u32.totalorder %s4276_s10, %s4561_s30 }
  0x4d   : > { %p4284_p10 = por %p4283_p6, %p4282_p13 }
  0x4e   : > { %p4280_p1 = pneg %p4279_p2 }
  0x4f   : > { %p4286_p5 = por %p4285_p3, %p4284_p10 }
  0x51   : > { %p4287_p9 = pnand %p4286_p5, %p4280_p1 }
  0x53   : > { %4290 = shalt.err (!%p4287_p9)
}
  0x54   : > { %s4291_s20 = scalar_lea.vmem %s4563_s6, 256  ;;  %s4384_s29 = smov [#allocation2]  }
  0x55   : > { %p4292_p12 = scmp.ne.s32.totalorder %s4563_s6, %s4291_s20  ;;  %s4296_s5 = sshll.u32 %s4384_s29, 4  ;;  %s4297_s5 = int_to_ptr.vmem [resolvable:$false] %s4296_s5 }
  0x56   : > { %s4298_s12 = scalar_lea.vmem %s4297_s5, 512  ;;  %p4299_p4 = scmp.lt.s32.totalorder %s4563_s6, %s4297_s5 }
  0x57   : > { %p4294_p2 = pnand %p4292_p12, %p4278_p0  ;;  %p4300_p13 = scmp.lt.s32.totalorder %s4298_s12, %s4291_s20 }
  0x59   : > { %p4295_p7 = pneg %p4294_p2  ;;  %p4301_p6 = por %p4300_p13, %p4299_p4 }
  0x5b   : > { %p4302_p10 = pnand %p4301_p6, %p4295_p7 }
  0x5d   : > { %4305 = shalt.err (!%p4302_p10)
}
  0x5e   : > { %4110 = dma.hbm_to_vmem [thread:$0]  (!%p4565_p11), %s4561_s30, 256, %s4563_s6, %s4569_s9, %s4382_s7, %s4382_s7, %s4383_s8  }
  0x5f   : > { %206 = sbr.rel (%p4465_p8) target bundleno = 2160 (0x870), region = 36  ;;  %s4603_s10 = sand.u32 (!%p4465_p8), 1, %s4368_s16  }
  0x60   : > { %s3973_s13 = sshll.u32 (!%p4465_p8), %s4603_s10, 4  ;;  %s209_s24 = scalar_lea.sflag (!%p4465_p8), [#allocation3], %s4603_s10 }
  0x61   : > { %s4609_s25 = scalar_lea.vmem (!%p4465_p8), [#allocation2], %s3973_s13  ;;  %p5171_p4 = scmp.ne.s32.totalorder (!%p4465_p8), %s5164_s21, 0 }
  0x66   : > { %4351 = dma.done.wait (%p5171_p4), %s209_s24, 256  }
  0x67   : > { %4353 = vsyncadd (%p5171_p4), %s209_s24, 4294967040  ;;  %p5172_p7 = scmp.eq.s32.totalorder %s4446_s19, 0 }
  0x69   : > { %4355 = dma.done.wait (%p5172_p7), [#allocation6], 3072   ;;  %p5173_p8 = pmov %p5172_p7 }
  0x6a   : > { %v4385_v0 = vmov 0   ;;  %v250_v1 = vld [vmem:[#allocation5 + $0x8] sm:$0xff]  ;;  %v252_v2 = vld [vmem:[#allocation5 + $0x18] sm:$0xff]  ;;  %v249_v3 = vld [vmem:[#allocation5] sm:$0xff]  ;;  %vm273_vm0 = vcmask 523264   ;;  %v4386_v28 = vmov 0.0   ;;  %v345_v35 = vlaneseq }
  0x6b   : > { %4357 = vsyncadd (%p5173_p8), [#allocation6], 4294964224  ;;  %309 = vmatprep.mubr.bf16.mxu0 %v4385_v0  ;;  %v266_v4 = vpack.c.bf16 %v252_v2, %v250_v1  ;;  %v251_v5 = vld [vmem:[#allocation5 + $0x10] sm:$0xff]  ;;  %v254_v6 = vld [vmem:[#allocation5 + $0x28] sm:$0xff]  ;;  %4034 = vmatprep.subr.bf16.mxu1 %v4386_v28  ;;  %s4387_s21 = smov 96   ;;  %s4388_s23 = smov 112  }
  0x6c   : > { %v256_v7 = vld [vmem:[#allocation5 + $0x38] sm:$0xff]  ;;  %v265_v8 = vpack.c.bf16 %v251_v5, %v249_v3  ;;  %v253_v10 = vld [vmem:[#allocation5 + $0x20] sm:$0xff]  ;;  %v255_v11 = vld [vmem:[#allocation5 + $0x30] sm:$0xff]  ;;  %s4389_s7 = smov 80   ;;  %s4390_s8 = smov 64   ;;  %v4638_v43 = vshrl.u32 %v345_v35, 7 }
  0x6d   : > { %v268_v9 = vpack.c.bf16 %v256_v7, %v254_v6  ;;  %v258_v12 = vld [vmem:[#allocation5 + $0x48] sm:$0xff]  ;;  %277 = vmatprep.subr.bf16.mxu0 %v266_v4  ;;  %v260_v13 = vld [vmem:[#allocation5 + $0x58] sm:$0xff]  ;;  %v267_v14 = vpack.c.bf16 %v255_v11, %v253_v10  ;;  %v257_v16 = vld [vmem:[#allocation5 + $0x40] sm:$0xff]  ;;  %v4391_v33 = vmov 1983009808   ;;  %vm4393_vm1 = vmmov 0  }
  0x6e   : > { %278 = vmatpush1.bf16.msra.mxu0 %v265_v8  ;;  %v270_v15 = vpack.c.bf16 %v260_v13, %v258_v12  ;;  %v259_v17 = vld [vmem:[#allocation5 + $0x50] sm:$0xff]  ;;  %v262_v18 = vld [vmem:[#allocation5 + $0x68] sm:$0xff]  ;;  %v264_v19 = vld [vmem:[#allocation5 + $0x78] sm:$0xff]  ;;  %v343_v34 = vunpack.c.l.s4 %v4391_v33  ;;  %v4392_v40 = vmov 1934713408   ;;  %4036 = vmatprep.mubr.msk.bf16.mxu1 %vm4393_vm1, %v4386_v28  ;;  %vm1916_vm2 = vcmask 130048  }
  0x6f   : > { %279 = vmatprep.subr.bf16.mxu0 %v268_v9  ;;  %v269_v20 = vpack.c.bf16 %v259_v17, %v257_v16  ;;  %v272_v21 = vpack.c.bf16 %v264_v19, %v262_v18  ;;  %v261_v22 = vld [vmem:[#allocation5 + $0x60] sm:$0xff]  ;;  %v263_v23 = vld [vmem:[#allocation5 + $0x70] sm:$0xff]  ;;  %v247_v26 = vld [vmem:[%s4609_s25 + $0x8] sm:$0xff]  ;;  %v375_v41 = vunpack.c.l.s4 %v4392_v40  ;;  %s4394_s30 = smov 32   ;;  %s4395_s6 = smov 16   ;;  %vm3786_vm5 = vcmask 261120  }
  0x70   : > { %v271_v24 = vpack.c.bf16 %v263_v23, %v261_v22  ;;  %v246_v25 = vld [vmem:[%s4609_s25] sm:$0xff]  ;;  %v344_v42 = vunpack.c.0.s8 %v343_v34  ;;  %s4396_s9 = smov 48   ;;  %vm3789_vm6 = vcmask 392192   ;;  %s244_s20 = scalar_lea.vmem [#allocation8], %s3973_s13 }
  0x71   : > { %v248_v27 = vpack.c.bf16 %v247_v26, %v246_v25  ;;  %v376_v48 = vunpack.c.0.s8 %v375_v41  ;;  %s3872_s29 = sshll.u32 %s244_s20, 4  ;;  %s4006_s5 = sshll.u32 %s4446_s19, 8  ;;  %s5105_s29 = int_to_ptr.vmem [resolvable:$true] %s3872_s29 }
  0x72   : > { %280 = vmatpush1.bf16.msra.mxu0 %v267_v14  ;;  %v4643_v49 = vsub.s32 %v344_v42, %v4638_v43  ;;  %s5110_s25 = scalar_lea.hbm %s5160_s4, %s4006_s5  ;;  %s3859_s19 = scalar_lea.sflag [#allocation4], %s4603_s10 }
  0x73   : > { %281 = vmatprep.subr.bf16.mxu0 %v270_v15  ;;  %v4649_v58 = vsub.s32 %v376_v48, %v4638_v43  ;;  %s4306_s13 = scalar_lea.vmem %s5105_s29, 256  ;;  %p5174_p0 = scmp.ne.s32.totalorder %s5169_s26, 0 }
  0x74   : > { %p4307_p11 = scmp.ne.s32.totalorder %s5105_s29, %s4306_s13 }
  0x76   : > { %282 = vmatpush1.bf16.msra.mxu0 %v269_v20  ;;  %p4308_p1 = pnand %p4307_p11, %p5174_p0 }
  0x77   : > { %283 = vmatprep.subr.bf16.mxu0 %v272_v21 }
  0x78   : > { %p4309_p3 = pneg %p4308_p1 }
  0x7a   : > { %284 = vmatpush1.bf16.msra.mxu0 %v271_v24 }
  0x7b   : > { %4028 = vmatprep.subr.bf16.mxu0 %v4386_v28 }
  0x7d   : > { %3977 = vmatmul.mubr.msk.bf16.vlgmr.msra.gmra.mrb[0].mxu0 %vm273_vm0, %v248_v27 }
  0x7e   : > { %4030 = vmatprep.mubr.msk.bf16.mxu0 %vm4393_vm1, %v4386_v28 }
 0x150   : > { %v311_v29 = vpop.f32.mrb[0].mxu0 }
 0x151   : > { %328 = vrot.lane.b32.xlu1 %v311_v29, %s4387_s21  ;;  %322 = vrot.lane.b32.xlu0 %v311_v29, %s4388_s23  ;;  %v4626_v30 = vpop.f32.mrb[1].mxu0 }
 0x152   : > { %v315_v31 = vpop.f32.mrb[2].mxu0 }
 0x153   : > { %v4628_v32 = vpop.f32.mrb[3].mxu0 }
 0x155   : > { %330 = vrot.lane.b32.xlu1 %v315_v31, %s4387_s21  ;;  %324 = vrot.lane.b32.xlu0 %v315_v31, %s4388_s23 }
 0x159   : > { %336 = vrot.lane.b32.xlu1 %v315_v31, %s4389_s7  ;;  %334 = vrot.lane.b32.xlu0 %v311_v29, %s4389_s7 }
 0x15d   : > { %478 = vrot.lane.b32.xlu1 %v315_v31, %s4390_s8  ;;  %476 = vrot.lane.b32.xlu0 %v311_v29, %s4390_s8 }
 0x1c3   : > { %v329_v36 = vpop.permute.xlu1 %328  ;;  %v323_v37 = vpop.permute.xlu0 %322 }
 0x1c4   : > { %v340_v38 = vcombine.low %v311_v29, %v329_v36  ;;  %v341_v39 = vcombine.high %v311_v29, %v329_v36  ;;  %480 = vrot.lane.b32.xlu0 %v323_v37, %s4390_s8 }
 0x1c6   : > { %v348_v63 = vrot.slane %v340_v38, %v4643_v49  ;;  %v355_v0 = vrot.slane %v341_v39, %v4643_v49 }
 0x1c7   : > { %v331_v44 = vpop.permute.xlu1 %330  ;;  %v325_v45 = vpop.permute.xlu0 %324 }
 0x1c8   : > { %484 = vrot.lane.b32.xlu0 %v329_v36, %s4390_s8  ;;  %482 = vrot.lane.b32.xlu1 %v325_v45, %s4390_s8  ;;  %v408_v46 = vcombine.low %v315_v31, %v331_v44  ;;  %v409_v47 = vcombine.high %v315_v31, %v331_v44 }
 0x1ca   : > { %v416_v56 = vrot.slane %v408_v46, %v4643_v49  ;;  %v423_v57 = vrot.slane %v409_v47, %v4643_v49 }
 0x1cb   : > { %v337_v50 = vpop.permute.xlu1 %336  ;;  %v335_v51 = vpop.permute.xlu0 %334 }
 0x1cc   : > { %v424_v52 = vcombine.low %v325_v45, %v337_v50  ;;  %v425_v53 = vcombine.high %v325_v45, %v337_v50  ;;  %v356_v54 = vcombine.low %v323_v37, %v335_v51  ;;  %v357_v55 = vcombine.high %v323_v37, %v335_v51  ;;  %486 = vrot.lane.b32.xlu1 %v331_v44, %s4390_s8 }
 0x1cd   : > { %488 = vrot.lane.b32.xlu0 %v335_v51, %s4390_s8 }
 0x1ce   : > { %v432_v59 = vrot.slane %v424_v52, %v4643_v49  ;;  %v439_v60 = vrot.slane %v425_v53, %v4643_v49  ;;  %v364_v61 = vrot.slane %v356_v54, %v4643_v49  ;;  %v371_v62 = vrot.slane %v357_v55, %v4643_v49 }
 0x1d0   : > { %v440_v1 = vcombine.low %v416_v56, %v432_v59  ;;  %v441_v2 = vcombine.high %v416_v56, %v432_v59  ;;  %v456_v3 = vcombine.low %v423_v57, %v439_v60  ;;  %v457_v4 = vcombine.high %v423_v57, %v439_v60  ;;  %490 = vrot.lane.b32.xlu1 %v337_v50, %s4390_s8 }
 0x1d1   : > { %v372_v5 = vcombine.low %v348_v63, %v364_v61  ;;  %v373_v6 = vcombine.high %v348_v63, %v364_v61  ;;  %v388_v7 = vcombine.low %v355_v0, %v371_v62  ;;  %v389_v8 = vcombine.high %v355_v0, %v371_v62 }
 0x1d2   : > { %v448_v9 = vrot.slane %v440_v1, %v4649_v58  ;;  %v455_v10 = vrot.slane %v441_v2, %v4649_v58  ;;  %v464_v11 = vrot.slane %v456_v3, %v4649_v58  ;;  %v471_v12 = vrot.slane %v457_v4, %v4649_v58  ;;  %v477_v4 = vpop.permute.xlu0 %476 }
 0x1d3   : > { %v380_v13 = vrot.slane %v372_v5, %v4649_v58  ;;  %v387_v14 = vrot.slane %v373_v6, %v4649_v58  ;;  %v396_v15 = vrot.slane %v388_v7, %v4649_v58  ;;  %v403_v16 = vrot.slane %v389_v8, %v4649_v58  ;;  %v479_v5 = vpop.permute.xlu1 %478 }
 0x1d4   : > { %v472_v17 = vcombine.high %v448_v9, %v4386_v28  ;;  %v473_v18 = vcombine.high %v455_v10, %v4386_v28  ;;  %v474_v19 = vcombine.high %v464_v11, %v4386_v28  ;;  %v475_v20 = vcombine.high %v471_v12, %v4386_v28 }
 0x1d5   : > { %v3980_v21 = vpack.c.bf16 %v464_v11, %v448_v9  ;;  %v3981_v22 = vpack.c.bf16 %v471_v12, %v455_v10  ;;  %v404_v23 = vcombine.high %v380_v13, %v4386_v28  ;;  %v405_v24 = vcombine.high %v387_v14, %v4386_v28 }
 0x1d6   : > { %v3984_v25 = vpack.c.bf16 %v474_v19, %v472_v17  ;;  %v3985_v26 = vpack.c.bf16 %v475_v20, %v473_v18  ;;  %v406_v27 = vcombine.high %v396_v15, %v4386_v28  ;;  %v407_v29 = vcombine.high %v403_v16, %v4386_v28 }
 0x1d7   : > { %v863_v31 = vrot.slane %v3980_v21, %v4643_v49  ;;  %v871_v33 = vrot.slane %v3981_v22, %v4643_v49  ;;  %v3978_v34 = vpack.c.bf16 %v396_v15, %v380_v13  ;;  %v3979_v36 = vpack.c.bf16 %v403_v16, %v387_v14 }
 0x1d8   : > { %v913_v37 = vrot.slane %v3984_v25, %v4643_v49  ;;  %v921_v38 = vrot.slane %v3985_v26, %v4643_v49  ;;  %v3982_v39 = vpack.c.bf16 %v406_v27, %v404_v23  ;;  %v3983_v40 = vpack.c.bf16 %v407_v29, %v405_v24 }
 0x1d9   : > { %v880_v41 = vcombine.low %v863_v31, %v871_v33  ;;  %v847_v42 = vrot.slane %v3978_v34, %v4643_v49  ;;  %v855_v44 = vrot.slane %v3979_v36, %v4643_v49 }
 0x1da   : > { %v930_v45 = vcombine.low %v913_v37, %v921_v38  ;;  %v897_v46 = vrot.slane %v3982_v39, %v4643_v49  ;;  %v905_v47 = vrot.slane %v3983_v40, %v4643_v49 }
 0x1db   : > { %v872_v48 = vcombine.low %v847_v42, %v855_v44  ;;  %v887_v50 = vrot.slane %v880_v41, %v4649_v58 }
 0x1dc   : > { %v922_v51 = vcombine.low %v897_v46, %v905_v47  ;;  %v937_v52 = vrot.slane %v930_v45, %v4649_v58 }
 0x1dd   : > { %v879_v53 = vrot.slane %v872_v48, %v4649_v58 }
 0x1de   : > { %v929_v54 = vrot.slane %v922_v51, %v4649_v58 }
 0x1df   : > { %v4687_v55 = vcombine.low %v879_v53, %v887_v50  ;;  %v4689_v56 = vcombine.high %v879_v53, %v887_v50 }
 0x1e0   : > { %v4691_v57 = vcombine.low %v929_v54, %v937_v52  ;;  %v4693_v59 = vcombine.high %v929_v54, %v937_v52 }
 0x1e1   : > { %v943_v60 = vshrl.u32 %v4687_v55, 16  ;;  %v949_v61 = vshrl.u32 %v4689_v56, 16 }
 0x1e2   : > { %v942_v62 = vpack.i.b16 %v4691_v57, %v4687_v55  ;;  %v944_v63 = vshrl.u32 %v4691_v57, 16  ;;  %v950_v0 = vshrl.u32 %v4693_v59, 16  ;;  %v948_v1 = vpack.i.b16 %v4693_v59, %v4689_v56 }
 0x1e4   : > { %v4703_v2 = vpack.i.b16 %v944_v63, %v943_v60  ;;  %v4705_v3 = vpack.i.b16 %v950_v0, %v949_v61 }
 0x236   : > { %v481_v6 = vpop.permute.xlu0 %480 }
 0x23a   : > { %v483_v7 = vpop.permute.xlu1 %482  ;;  %v485_v8 = vpop.permute.xlu0 %484 }
 0x23b   : > { %v500_v9 = vcombine.low %v477_v4, %v485_v8  ;;  %v501_v10 = vcombine.high %v477_v4, %v485_v8 }
 0x23d   : > { %v508_v15 = vrot.slane %v500_v9, %v4643_v49  ;;  %v515_v16 = vrot.slane %v501_v10, %v4643_v49 }
 0x23e   : > { %v487_v11 = vpop.permute.xlu1 %486 }
 0x23f   : > { %v489_v12 = vpop.permute.xlu0 %488  ;;  %v568_v25 = vcombine.low %v479_v5, %v487_v11  ;;  %v569_v45 = vcombine.high %v479_v5, %v487_v11 }
 0x240   : > { %v516_v13 = vcombine.low %v481_v6, %v489_v12  ;;  %v517_v14 = vcombine.high %v481_v6, %v489_v12 }
 0x241   : > { %v576_v37 = vrot.slane %v568_v25, %v4643_v49  ;;  %v583_v53 = vrot.slane %v569_v45, %v4643_v49 }
 0x242   : > { %v524_v17 = vrot.slane %v516_v13, %v4643_v49  ;;  %v531_v18 = vrot.slane %v517_v14, %v4643_v49  ;;  %v491_v19 = vpop.permute.xlu1 %490 }
 0x243   : > { %v584_v20 = vcombine.low %v483_v7, %v491_v19  ;;  %v585_v38 = vcombine.high %v483_v7, %v491_v19 }
 0x244   : > { %v548_v21 = vcombine.low %v515_v16, %v531_v18  ;;  %v532_v22 = vcombine.low %v508_v15, %v524_v17  ;;  %v549_v23 = vcombine.high %v515_v16, %v531_v18  ;;  %v533_v24 = vcombine.high %v508_v15, %v524_v17 }
 0x245   : > { %v592_v29 = vrot.slane %v584_v20, %v4643_v49  ;;  %v599_v46 = vrot.slane %v585_v38, %v4643_v49 }
 0x246   : > { %v556_v26 = vrot.slane %v548_v21, %v4649_v58  ;;  %v540_v27 = vrot.slane %v532_v22, %v4649_v58  ;;  %v563_v34 = vrot.slane %v549_v23, %v4649_v58  ;;  %v547_v36 = vrot.slane %v533_v24, %v4649_v58 }
 0x247   : > { %v600_v39 = vcombine.low %v576_v37, %v592_v29  ;;  %v601_v47 = vcombine.high %v576_v37, %v592_v29  ;;  %v616_v54 = vcombine.low %v583_v53, %v599_v46  ;;  %v617_v4 = vcombine.high %v583_v53, %v599_v46 }
 0x248   : > { %v812_v31 = vpack.c.bf16 %v556_v26, %v556_v26  ;;  %v808_v33 = vpack.c.bf16 %v540_v27, %v540_v27  ;;  %v814_v40 = vpack.c.bf16 %v563_v34, %v563_v34  ;;  %v810_v41 = vpack.c.bf16 %v547_v36, %v547_v36 }
 0x249   : > { %v565_v42 = vcombine.high %v547_v36, %v4386_v28  ;;  %v564_v44 = vcombine.high %v540_v27, %v4386_v28  ;;  %v566_v51 = vcombine.high %v556_v26, %v4386_v28  ;;  %v608_v52 = vrot.slane %v600_v39, %v4649_v58 }
 0x24a   : > { %1016 = vxpose.xlu1.c.b16.start.end [1/1] (short) (narrow) %v812_v31, 16  ;;  %952 = vxpose.xlu0.c.b16.start.end [1/1] (short) (narrow) %v808_v33, 16  ;;  %v567_v63 = vcombine.high %v563_v34, %v4386_v28  ;;  %v615_v0 = vrot.slane %v601_v47, %v4649_v58  ;;  %v624_v8 = vrot.slane %v616_v54, %v4649_v58 }
 0x24b   : > { %v811_v48 = vpack.c.bf16 %v565_v42, %v565_v42  ;;  %v809_v50 = vpack.c.bf16 %v564_v44, %v564_v44  ;;  %v813_v60 = vpack.c.bf16 %v566_v51, %v566_v51  ;;  %v816_v61 = vpack.c.bf16 %v608_v52, %v608_v52 }
 0x24c   : > { %v815_v5 = vpack.c.bf16 %v567_v63, %v567_v63  ;;  %v818_v6 = vpack.c.bf16 %v615_v0, %v615_v0  ;;  %v632_v7 = vcombine.high %v608_v52, %v4386_v28  ;;  %v820_v10 = vpack.c.bf16 %v624_v8, %v624_v8 }
 0x24d   : > { %v633_v11 = vcombine.high %v615_v0, %v4386_v28  ;;  %v631_v12 = vrot.slane %v617_v4, %v4649_v58  ;;  %v634_v15 = vcombine.high %v624_v8, %v4386_v28 }
 0x24e   : > { %1048 = vxpose.xlu1.c.b16.start.end [1/1] (short) (narrow) %v814_v40, 16  ;;  %984 = vxpose.xlu0.c.b16.start.end [1/1] (short) (narrow) %v810_v41, 16  ;;  %v817_v9 = vpack.c.bf16 %v632_v7, %v632_v7 }
 0x24f   : > { %v819_v13 = vpack.c.bf16 %v633_v11, %v633_v11  ;;  %v822_v14 = vpack.c.bf16 %v631_v12, %v631_v12  ;;  %v821_v16 = vpack.c.bf16 %v634_v15, %v634_v15  ;;  %v635_v17 = vcombine.high %v631_v12, %v4386_v28 }
 0x251   : > { %v823_v18 = vpack.c.bf16 %v635_v17, %v635_v17 }
 0x252   : > { %1000 = vxpose.xlu0.c.b16.start.end [1/1] (short) (narrow) %v811_v48, 16  ;;  %968 = vxpose.xlu1.c.b16.start.end [1/1] (short) (narrow) %v809_v50, 16 }
 0x256   : > { %1032 = vxpose.xlu0.c.b16.start.end [1/1] (short) (narrow) %v813_v60, 16  ;;  %1080 = vxpose.xlu1.c.b16.start.end [1/1] (short) (narrow) %v816_v61, 16 }
 0x25a   : > { %1064 = vxpose.xlu0.c.b16.start.end [1/1] (short) (narrow) %v815_v5, 16  ;;  %1112 = vxpose.xlu1.c.b16.start.end [1/1] (short) (narrow) %v818_v6, 16 }
 0x25e   : > { %1096 = vxpose.xlu0.c.b16.start.end [1/1] (short) (narrow) %v817_v9, 16  ;;  %1144 = vxpose.xlu1.c.b16.start.end [1/1] (short) (narrow) %v820_v10, 16 }
 0x262   : > { %1128 = vxpose.xlu0.c.b16.start.end [1/1] (short) (narrow) %v819_v13, 16  ;;  %1176 = vxpose.xlu1.c.b16.start.end [1/1] (short) (narrow) %v822_v14, 16 }
 0x266   : > { %1160 = vxpose.xlu0.c.b16.start.end [1/1] (short) (narrow) %v821_v16, 16 }
 0x26a   : > { %1192 = vxpose.xlu0.c.b16.start.end [1/1] (short) (narrow) %v823_v18, 16 }
 0x2b0   : > { %v4731_v19 = vpop.trf.xlu1  ;;  %v4733_v20 = vpop.trf.xlu0 }
 0x2b1   : > { %v1208_v40 = vcombine.low %v4733_v20, %v4731_v19  ;;  %v1209_v6 = vcombine.high %v4733_v20, %v4731_v19 }
 0x2b3   : > { %v1216_v48 = vrot.slane %v1208_v40, %v4643_v49 }
 0x2b4   : > { %v4735_v21 = vpop.trf.xlu1  ;;  %v4737_v22 = vpop.trf.xlu0 }
 0x2b5   : > { %v1224_v37 = vcombine.low %v4737_v22, %v4735_v21  ;;  %v1225_v16 = vcombine.high %v4737_v22, %v4735_v21 }
 0x2b7   : > { %v1232_v45 = vrot.slane %v1224_v37, %v4643_v49 }
 0x2b8   : > { %v1008_v23 = vpop.trf.xlu0  ;;  %v4739_v24 = vpop.trf.xlu1 }
 0x2b9   : > { %v1272_v54 = vcombine.low %v1216_v48, %v1232_v45 }
 0x2bb   : > { %v1280_v11 = vrot.slane %v1272_v54, %v4649_v58 }
 0x2bc   : > { %v1040_v25 = vpop.trf.xlu0  ;;  %v1088_v26 = vpop.trf.xlu1 }
 0x2bd   : > { %v1344_v46 = vcombine.low %v4739_v24, %v1040_v25  ;;  %v1345_v19 = vcombine.high %v4739_v24, %v1040_v25 }
 0x2bf   : > { %v1352_v60 = vrot.slane %v1344_v46, %v4643_v49 }
 0x2c0   : > { %v1072_v27 = vpop.trf.xlu0  ;;  %v1120_v29 = vpop.trf.xlu1 }
 0x2c1   : > { %v1360_v41 = vcombine.low %v1008_v23, %v1072_v27  ;;  %v1361_v7 = vcombine.high %v1008_v23, %v1072_v27 }
 0x2c3   : > { %v1368_v50 = vrot.slane %v1360_v41, %v4643_v49  ;;  %v1375_v20 = vrot.slane %v1361_v7, %v4643_v49 }
 0x2c4   : > { %v1104_v31 = vpop.trf.xlu0  ;;  %v1152_v33 = vpop.trf.xlu1 }
 0x2c5   : > { %v1240_v38 = vcombine.low %v1088_v26, %v1152_v33  ;;  %v1408_v63 = vcombine.low %v1352_v60, %v1368_v50  ;;  %v1409_v12 = vcombine.high %v1352_v60, %v1368_v50  ;;  %v1241_v23 = vcombine.high %v1088_v26, %v1152_v33 }
 0x2c6   : > { %v1239_v26 = vrot.slane %v1225_v16, %v4643_v49  ;;  %v1359_v33 = vrot.slane %v1345_v19, %v4643_v49  ;;  %v1223_v50 = vrot.slane %v1209_v6, %v4643_v49 }
 0x2c7   : > { %v1248_v47 = vrot.slane %v1240_v38, %v4643_v49  ;;  %v1416_v18 = vrot.slane %v1408_v63, %v4649_v58  ;;  %v1273_v38 = vcombine.high %v1216_v48, %v1232_v45 }
 0x2c8   : > { %v1136_v34 = vpop.trf.xlu0  ;;  %v1184_v36 = vpop.trf.xlu1  ;;  %v1425_v16 = vcombine.high %v1359_v33, %v1375_v20  ;;  %v1289_v19 = vcombine.high %v1223_v50, %v1239_v26 }
 0x2c9   : > { %v1256_v39 = vcombine.low %v1120_v29, %v1184_v36  ;;  %v1257_v13 = vcombine.high %v1120_v29, %v1184_v36 }
 0x2cb   : > { %v1264_v42 = vrot.slane %v1256_v39, %v4643_v49  ;;  %v1271_v36 = vrot.slane %v1257_v13, %v4643_v49  ;;  %v1423_v39 = vrot.slane %v1409_v12, %v4649_v58 }
 0x2cc   : > { %v1168_v44 = vpop.trf.xlu0 }
 0x2cd   : > { %v1304_v51 = vcombine.low %v1248_v47, %v1264_v42  ;;  %v1376_v52 = vcombine.low %v1104_v31, %v1168_v44  ;;  %v1305_v14 = vcombine.high %v1248_v47, %v1264_v42  ;;  %v1377_v15 = vcombine.high %v1104_v31, %v1168_v44 }
 0x2ce   : > { %v1255_v42 = vrot.slane %v1241_v23, %v4643_v49  ;;  %v1287_v44 = vrot.slane %v1273_v38, %v4649_v58 }
 0x2cf   : > { %v1384_v0 = vrot.slane %v1376_v52, %v4643_v49  ;;  %v1312_v5 = vrot.slane %v1304_v51, %v4649_v58  ;;  %v1391_v21 = vrot.slane %v1377_v15, %v4643_v49  ;;  %v1319_v22 = vrot.slane %v1305_v14, %v4649_v58 }
 0x2d0   : > { %v1200_v53 = vpop.trf.xlu0  ;;  %v1424_v51 = vcombine.low %v1359_v33, %v1375_v20  ;;  %v1320_v52 = vcombine.low %v1255_v42, %v1271_v36 }
 0x2d1   : > { %v1392_v61 = vcombine.low %v1136_v34, %v1200_v53  ;;  %v1393_v8 = vcombine.high %v1136_v34, %v1200_v53  ;;  %v1336_v17 = vcombine.low %v1280_v11, %v1312_v5  ;;  %v1337_v25 = vcombine.high %v1280_v11, %v1312_v5 }
 0x2d2   : > { %v1338_v60 = vcombine.low %v1287_v44, %v1319_v22  ;;  %v1432_v7 = vrot.slane %v1424_v51, %v4649_v58  ;;  %v1328_v6 = vrot.slane %v1320_v52, %v4649_v58 }
 0x2d3   : > { %v1400_v4 = vrot.slane %v1392_v61, %v4643_v49  ;;  %v1407_v27 = vrot.slane %v1393_v8, %v4643_v49  ;;  %v1484_v41 = vshrl.u32 %v1336_v17, 16  ;;  %v1492_v54 = vshrl.u32 %v1337_v25, 16 }
 0x2d4   : > { %v1288_v61 = vcombine.low %v1223_v50, %v1239_v26 }
 0x2d5   : > { %v1440_v9 = vcombine.low %v1384_v0, %v1400_v4  ;;  %v1441_v10 = vcombine.high %v1384_v0, %v1400_v4  ;;  %v1456_v45 = vcombine.low %v1391_v21, %v1407_v27  ;;  %v1457_v12 = vcombine.high %v1391_v21, %v1407_v27 }
 0x2d6   : > { %v1296_v11 = vrot.slane %v1288_v61, %v4649_v58 }
 0x2d7   : > { %v1448_v37 = vrot.slane %v1440_v9, %v4649_v58  ;;  %v1455_v31 = vrot.slane %v1441_v10, %v4649_v58  ;;  %v1464_v5 = vrot.slane %v1456_v45, %v4649_v58  ;;  %v1500_v9 = vshrl.u32 %v1338_v60, 16 }
 0x2d8   : > { %v1339_v10 = vcombine.high %v1287_v44, %v1319_v22  ;;  %v1340_v38 = vcombine.low %v1296_v11, %v1328_v6  ;;  %v1439_v22 = vrot.slane %v1425_v16, %v4649_v58 }
 0x2d9   : > { %v1472_v34 = vcombine.low %v1416_v18, %v1448_v37  ;;  %v1473_v29 = vcombine.high %v1416_v18, %v1448_v37  ;;  %v1474_v48 = vcombine.low %v1423_v39, %v1455_v31  ;;  %v1475_v4 = vcombine.high %v1423_v39, %v1455_v31 }
 0x2da   : > { %v1476_v15 = vcombine.low %v1432_v7, %v1464_v5  ;;  %v1508_v37 = vshrl.u32 %v1339_v10, 16  ;;  %v1471_v31 = vrot.slane %v1457_v12, %v4649_v58  ;;  %v1516_v21 = vshrl.u32 %v1340_v38, 16 }
 0x2db   : > { %v1482_v40 = vpack.i.b16 %v1472_v34, %v1336_v17  ;;  %v1485_v24 = vshrl.u32 %v1472_v34, 16  ;;  %v1493_v47 = vshrl.u32 %v1473_v29, 16  ;;  %v1490_v53 = vpack.i.b16 %v1473_v29, %v1337_v25 }
 0x2dc   : > { %v1501_v0 = vshrl.u32 %v1474_v48, 16  ;;  %v1498_v8 = vpack.i.b16 %v1474_v48, %v1338_v60  ;;  %v1509_v14 = vshrl.u32 %v1475_v4, 16  ;;  %v1321_v17 = vcombine.high %v1255_v42, %v1271_v36 }
 0x2dd   : > { %1544 = vxpose.xlu1.c.b16.start.end [1/1] (short) (narrow) %v1482_v40, 16  ;;  %v1486_v46 = vpack.i.b16 %v1485_v24, %v1484_v41  ;;  %v1494_v63 = vpack.i.b16 %v1493_v47, %v1492_v54  ;;  %v1506_v18 = vpack.i.b16 %v1475_v4, %v1339_v10  ;;  %v1517_v34 = vshrl.u32 %v1476_v15, 16 }
 0x2de   : > { %v1502_v13 = vpack.i.b16 %v1501_v0, %v1500_v9  ;;  %v1510_v23 = vpack.i.b16 %v1509_v14, %v1508_v37  ;;  %v1477_v29 = vcombine.high %v1432_v7, %v1464_v5  ;;  %v1514_v27 = vpack.i.b16 %v1476_v15, %v1340_v38 }
 0x2df   : > { %1560 = vxpose.xlu0.c.b16.start.end [1/1] (short) (narrow) %v1486_v46, 16  ;;  %v1341_v39 = vcombine.high %v1296_v11, %v1328_v6  ;;  %v1335_v20 = vrot.slane %v1321_v17, %v4649_v58  ;;  %v1518_v36 = vpack.i.b16 %v1517_v34, %v1516_v21  ;;  %v1303_v41 = vrot.slane %v1289_v19, %v4649_v58 }
 0x2e0   : > { %v1525_v40 = vshrl.u32 %v1477_v29, 16  ;;  %v1478_v24 = vcombine.low %v1439_v22, %v1471_v31  ;;  %v1479_v45 = vcombine.high %v1439_v22, %v1471_v31 }
 0x2e1   : > { %1576 = vxpose.xlu1.c.b16.start.end [1/1] (short) (narrow) %v1490_v53, 16  ;;  %v1522_v25 = vpack.i.b16 %v1477_v29, %v1341_v39  ;;  %v1524_v26 = vshrl.u32 %v1341_v39, 16  ;;  %v1342_v33 = vcombine.low %v1303_v41, %v1335_v20  ;;  %v1343_v48 = vcombine.high %v1303_v41, %v1335_v20 }
 0x2e2   : > { %v1533_v44 = vshrl.u32 %v1478_v24, 16  ;;  %v1541_v51 = vshrl.u32 %v1479_v45, 16 }
 0x2e3   : > { %1592 = vxpose.xlu0.c.b16.start.end [1/1] (short) (narrow) %v1494_v63, 16  ;;  %v1526_v42 = vpack.i.b16 %v1525_v40, %v1524_v26  ;;  %v1530_v46 = vpack.i.b16 %v1478_v24, %v1342_v33  ;;  %v1532_v47 = vshrl.u32 %v1342_v33, 16  ;;  %v1538_v52 = vpack.i.b16 %v1479_v45, %v1343_v48 }
 0x2e4   : > { %v1540_v53 = vshrl.u32 %v1343_v48, 16 }
 0x2e5   : > { %1608 = vxpose.xlu1.c.b16.start.end [1/1] (short) (narrow) %v1498_v8, 16  ;;  %v1534_v50 = vpack.i.b16 %v1533_v44, %v1532_v47 }
 0x2e6   : > { %v1542_v54 = vpack.i.b16 %v1541_v51, %v1540_v53 }
 0x2e7   : > { %1624 = vxpose.xlu0.c.b16.start.end [1/1] (short) (narrow) %v1502_v13, 16 }
 0x2e9   : > { %1640 = vxpose.xlu1.c.b16.start.end [1/1] (short) (narrow) %v1506_v18, 16 }
 0x2eb   : > { %1656 = vxpose.xlu0.c.b16.start.end [1/1] (short) (narrow) %v1510_v23, 16 }
 0x2ed   : > { %1672 = vxpose.xlu1.c.b16.start.end [1/1] (short) (narrow) %v1514_v27, 16 }
 0x2ef   : > { %1688 = vxpose.xlu0.c.b16.start.end [1/1] (short) (narrow) %v1518_v36, 16 }
 0x2f1   : > { %1704 = vxpose.xlu1.c.b16.start.end [1/1] (short) (narrow) %v1522_v25, 16 }
 0x2f3   : > { %1720 = vxpose.xlu0.c.b16.start.end [1/1] (short) (narrow) %v1526_v42, 16 }
 0x2f5   : > { %1736 = vxpose.xlu1.c.b16.start.end [1/1] (short) (narrow) %v1530_v46, 16 }
 0x2f7   : > { %1752 = vxpose.xlu0.c.b16.start.end [1/1] (short) (narrow) %v1534_v50, 16 }
 0x2f9   : > { %1768 = vxpose.xlu1.c.b16.start.end [1/1] (short) (narrow) %v1538_v52, 16 }
 0x2fb   : > { %1784 = vxpose.xlu0.c.b16.start.end [1/1] (short) (narrow) %v1542_v54, 16 }
 0x2fd   : > { %638 = vrot.lane.b32.xlu1 %v4626_v30, %s4388_s23 }
 0x301   : > { %644 = vrot.lane.b32.xlu1 %v4626_v30, %s4387_s21 }
 0x304   : > { %640 = vrot.lane.b32.xlu0 %v4628_v32, %s4388_s23 }
 0x305   : > { %646 = vrot.lane.b32.xlu1 %v4628_v32, %s4387_s21  ;;  %s4397_s21 = smov [#allocation8]  }
 0x306   : > { %s4310_s23 = sshll.u32 %s4397_s21, 4  ;;  %s4311_s23 = int_to_ptr.vmem [resolvable:$false] %s4310_s23 }
 0x307   : > { %p4313_p5 = scmp.lt.s32.totalorder %s5105_s29, %s4311_s23 }
 0x308   : > { %650 = vrot.lane.b32.xlu0 %v4626_v30, %s4389_s7 }
 0x309   : > { %652 = vrot.lane.b32.xlu1 %v4628_v32, %s4389_s7  ;;  %s4312_s7 = scalar_lea.vmem %s4311_s23, 512 }
 0x30a   : > { %p4314_p9 = scmp.lt.s32.totalorder %s4312_s7, %s4306_s13 }
 0x30c   : > { %p4315_p12 = por %p4314_p9, %p4313_p5 }
 0x30e   : > { %p4316_p2 = pnand %p4315_p12, %p4309_p3 }
 0x343   : > { %v1552_v60 = vpop.trf.xlu1 }
 0x345   : > { %v1568_v61 = vpop.trf.xlu0 }
 0x347   : > { %v1584_v63 = vpop.trf.xlu1 }
 0x349   : > { %v1600_v0 = vpop.trf.xlu0 }
 0x34b   : > { %v1616_v4 = vpop.trf.xlu1 }
 0x34c   : > { %v1800_v14 = vcombine.low %v1552_v60, %v1616_v4 }
 0x34d   : > { %v1632_v5 = vpop.trf.xlu0 }
 0x34e   : > { %v1850_v16 = vcombine.low %v1568_v61, %v1632_v5  ;;  %v1807_v19 = vrot.slane %v1800_v14, %v4643_v49 }
 0x34f   : > { %v1648_v7 = vpop.trf.xlu1 }
 0x350   : > { %v1808_v12 = vcombine.low %v1584_v63, %v1648_v7  ;;  %v1857_v31 = vrot.slane %v1850_v16, %v4643_v49 }
 0x351   : > { %v1664_v8 = vpop.trf.xlu0 }
 0x352   : > { %v1858_v15 = vcombine.low %v1600_v0, %v1664_v8  ;;  %v1815_v18 = vrot.slane %v1808_v12, %v4643_v49 }
 0x353   : > { %v1680_v9 = vpop.trf.xlu1 }
 0x354   : > { %v1865_v23 = vrot.slane %v1858_v15, %v4643_v49  ;;  %v1832_v27 = vcombine.low %v1807_v19, %v1815_v18 }
 0x355   : > { %v1696_v10 = vpop.trf.xlu0 }
 0x356   : > { %v1882_v36 = vcombine.low %v1857_v31, %v1865_v23  ;;  %v1839_v25 = vrot.slane %v1832_v27, %v4649_v58 }
 0x357   : > { %v1712_v6 = vpop.trf.xlu1 }
 0x358   : > { %v1889_v42 = vrot.slane %v1882_v36, %v4649_v58 }
 0x359   : > { %v1728_v11 = vpop.trf.xlu0 }
 0x35b   : > { %v1744_v13 = vpop.trf.xlu1 }
 0x35c   : > { %v1816_v37 = vcombine.low %v1680_v9, %v1744_v13 }
 0x35d   : > { %v1760_v17 = vpop.trf.xlu0 }
 0x35e   : > { %v1866_v34 = vcombine.low %v1696_v10, %v1760_v17  ;;  %v1823_v21 = vrot.slane %v1816_v37, %v4643_v49 }
 0x35f   : > { %v1776_v38 = vpop.trf.xlu1 }
 0x360   : > { %v1824_v29 = vcombine.low %v1712_v6, %v1776_v38  ;;  %v1873_v40 = vrot.slane %v1866_v34, %v4643_v49 }
 0x361   : > { %v1792_v22 = vpop.trf.xlu0 }
 0x362   : > { %v1831_v39 = vrot.slane %v1824_v29, %v4643_v49  ;;  %v1874_v20 = vcombine.low %v1728_v11, %v1792_v22 }
 0x364   : > { %v1840_v41 = vcombine.low %v1823_v21, %v1831_v39  ;;  %v1881_v24 = vrot.slane %v1874_v20, %v4643_v49 }
 0x366   : > { %v1847_v26 = vrot.slane %v1840_v41, %v4649_v58  ;;  %v1890_v33 = vcombine.low %v1873_v40, %v1881_v24 }
 0x368   : > { %v1848_v44 = vcombine.low %v1839_v25, %v1847_v26  ;;  %v1897_v45 = vrot.slane %v1890_v33, %v4649_v58  ;;  %v1849_v46 = vcombine.high %v1839_v25, %v1847_v26 }
 0x36a   : > { %v1898_v47 = vcombine.low %v1889_v42, %v1897_v45  ;;  %v1899_v48 = vcombine.high %v1889_v42, %v1897_v45  ;;  %v1904_v51 = vshrl.u32 %v1848_v44, 16  ;;  %v1912_v60 = vshrl.u32 %v1849_v46, 16 }
 0x36c   : > { %v1902_v50 = vpack.i.b16 %v1898_v47, %v1848_v44  ;;  %v1905_v52 = vshrl.u32 %v1898_v47, 16  ;;  %v1913_v53 = vshrl.u32 %v1899_v48, 16  ;;  %v1910_v0 = vpack.i.b16 %v1899_v48, %v1849_v46 }
 0x36e   : > { %4029 = vmatpush3.bf16.msra.mxu0 %v1902_v50  ;;  %v1906_v54 = vpack.i.b16 %v1905_v52, %v1904_v51  ;;  %v1914_v63 = vpack.i.b16 %v1913_v53, %v1912_v60 }
 0x36f   : > { %v639_v61 = vpop.permute.xlu1 %638  ;;  %4046 = vmatprep.subr.bf16.mxu0 %v4386_v28 }
 0x370   : > { %4035 = vmatpush3.bf16.msra.mxu1 %v1906_v54 }
 0x371   : > { %4031 = vmatmul.mubr.msk.bf16.vlgmr.msra.gmra.mrb[4].mxu0 %vm1916_vm2, %v942_v62  ;;  %4040 = vmatprep.subr.bf16.mxu1 %v4386_v28 }
 0x372   : > { %4047 = vmatpush3.bf16.msra.mxu0 %v1914_v63  ;;  %4048 = vmatprep.mubr.msk.bf16.mxu0 %vm4393_vm1, %v4386_v28 }
 0x373   : > { %4037 = vmatmul.mubr.msk.bf16.vlgmr.msra.gmra.mrb[0].mxu1 %vm1916_vm2, %v4703_v2  ;;  %v645_v4 = vpop.permute.xlu1 %644  ;;  %4058 = vmatprep.subr.bf16.mxu0 %v4386_v28 }
 0x374   : > { %4041 = vmatpush3.bf16.msra.mxu1 %v1910_v0  ;;  %4042 = vmatprep.mubr.msk.bf16.mxu1 %vm4393_vm1, %v4386_v28  ;;  %v656_v62 = vcombine.low %v4626_v30, %v645_v4  ;;  %v657_v2 = vcombine.high %v4626_v30, %v645_v4 }
 0x375   : > { %4052 = vmatprep.subr.bf16.mxu1 %v4386_v28 }
 0x376   : > { %v641_v55 = vpop.permute.xlu0 %640  ;;  %v664_v9 = vrot.slane %v656_v62, %v4643_v49  ;;  %v671_v11 = vrot.slane %v657_v2, %v4643_v49 }
 0x377   : > { %v647_v57 = vpop.permute.xlu1 %646 }
 0x378   : > { %v724_v59 = vcombine.low %v4628_v32, %v647_v57  ;;  %v725_v21 = vcombine.high %v4628_v32, %v647_v57 }
 0x379   : > { %4049 = vmatmul.mubr.msk.bf16.vlgmr.msra.gmra.mrb[8].mxu0 %vm1916_vm2, %v4705_v3 }
 0x37a   : > { %v651_v5 = vpop.permute.xlu0 %650  ;;  %4060 = vmatprep.mubr.msk.bf16.mxu0 %vm4393_vm1, %v4386_v28  ;;  %v732_v19 = vrot.slane %v724_v59, %v4643_v49  ;;  %v739_v25 = vrot.slane %v725_v21, %v4643_v49 }
 0x37b   : > { %v672_v7 = vcombine.low %v639_v61, %v651_v5  ;;  %v673_v8 = vcombine.high %v639_v61, %v651_v5  ;;  %4043 = vmatmul.mubr.msk.bf16.vlgmr.msra.gmra.mrb[4].mxu1 %vm1916_vm2, %v948_v1  ;;  %v653_v6 = vpop.permute.xlu1 %652 }
 0x37c   : > { %4054 = vmatprep.mubr.msk.bf16.mxu1 %vm4393_vm1, %v4386_v28  ;;  %v740_v13 = vcombine.low %v641_v55, %v653_v6  ;;  %v741_v29 = vcombine.high %v641_v55, %v653_v6 }
 0x37d   : > { %v680_v3 = vrot.slane %v672_v7, %v4643_v49  ;;  %v687_v10 = vrot.slane %v673_v8, %v4643_v49 }
 0x37e   : > { %v748_v17 = vrot.slane %v740_v13, %v4643_v49  ;;  %v755_v36 = vrot.slane %v741_v29, %v4643_v49 }
 0x37f   : > { %v688_v30 = vcombine.low %v664_v9, %v680_v3  ;;  %v689_v12 = vcombine.high %v664_v9, %v680_v3  ;;  %v704_v56 = vcombine.low %v671_v11, %v687_v10  ;;  %v705_v38 = vcombine.high %v671_v11, %v687_v10 }
 0x380   : > { %v756_v27 = vcombine.low %v732_v19, %v748_v17  ;;  %v757_v24 = vcombine.high %v732_v19, %v748_v17  ;;  %v772_v44 = vcombine.low %v739_v25, %v755_v36  ;;  %v773_v50 = vcombine.high %v739_v25, %v755_v36 }
 0x381   : > { %v696_v14 = vrot.slane %v688_v30, %v4649_v58  ;;  %v703_v16 = vrot.slane %v689_v12, %v4649_v58  ;;  %v712_v37 = vrot.slane %v704_v56, %v4649_v58  ;;  %v719_v22 = vrot.slane %v705_v38, %v4649_v58 }
 0x382   : > { %v764_v41 = vrot.slane %v756_v27, %v4649_v58  ;;  %v771_v32 = vrot.slane %v757_v24, %v4649_v58  ;;  %v780_v48 = vrot.slane %v772_v44, %v4649_v58  ;;  %v787_v54 = vrot.slane %v773_v50, %v4649_v58 }
 0x383   : > { %v824_v1 = vpack.c.bf16 %v696_v14, %v696_v14  ;;  %v720_v15 = vcombine.high %v696_v14, %v4386_v28  ;;  %v826_v23 = vpack.c.bf16 %v703_v16, %v703_v16  ;;  %v721_v34 = vcombine.high %v703_v16, %v4386_v28 }
 0x384   : > { %v828_v31 = vpack.c.bf16 %v712_v37, %v712_v37  ;;  %v722_v20 = vcombine.high %v712_v37, %v4386_v28  ;;  %v830_v40 = vpack.c.bf16 %v719_v22, %v719_v22  ;;  %v723_v33 = vcombine.high %v719_v22, %v4386_v28 }
 0x385   : > { %2212 = vxpose.xlu0.c.b16.start.end [1/1] (short) (narrow) %v824_v1, 16  ;;  %v825_v18 = vpack.c.bf16 %v720_v15, %v720_v15  ;;  %v827_v39 = vpack.c.bf16 %v721_v34, %v721_v34  ;;  %v832_v42 = vpack.c.bf16 %v764_v41, %v764_v41  ;;  %v788_v46 = vcombine.high %v764_v41, %v4386_v28 }
 0x386   : > { %v829_v26 = vpack.c.bf16 %v722_v20, %v722_v20  ;;  %v831_v45 = vpack.c.bf16 %v723_v33, %v723_v33  ;;  %v834_v47 = vpack.c.bf16 %v771_v32, %v771_v32  ;;  %v789_v52 = vcombine.high %v771_v32, %v4386_v28 }
 0x387   : > { %2228 = vxpose.xlu1.c.b16.start.end [1/1] (short) (narrow) %v825_v18, 16  ;;  %v833_v51 = vpack.c.bf16 %v788_v46, %v788_v46  ;;  %v836_v53 = vpack.c.bf16 %v780_v48, %v780_v48  ;;  %v790_v61 = vcombine.high %v780_v48, %v4386_v28  ;;  %v838_v63 = vpack.c.bf16 %v787_v54, %v787_v54 }
 0x388   : > { %v835_v60 = vpack.c.bf16 %v789_v52, %v789_v52  ;;  %v791_v4 = vcombine.high %v787_v54, %v4386_v28 }
 0x389   : > { %2244 = vxpose.xlu0.c.b16.start.end [1/1] (short) (narrow) %v826_v23, 16  ;;  %v837_v0 = vpack.c.bf16 %v790_v61, %v790_v61 }
 0x38a   : > { %v839_v55 = vpack.c.bf16 %v791_v4, %v791_v4 }
 0x38b   : > { %2276 = vxpose.xlu1.c.b16.start.end [1/1] (short) (narrow) %v828_v31, 16 }
 0x38d   : > { %2260 = vxpose.xlu0.c.b16.start.end [1/1] (short) (narrow) %v827_v39, 16 }
 0x38f   : > { %2308 = vxpose.xlu1.c.b16.start.end [1/1] (short) (narrow) %v830_v40, 16 }
 0x391   : > { %2292 = vxpose.xlu0.c.b16.start.end [1/1] (short) (narrow) %v829_v26, 16 }
 0x393   : > { %2340 = vxpose.xlu1.c.b16.start.end [1/1] (short) (narrow) %v832_v42, 16 }
 0x395   : > { %2324 = vxpose.xlu0.c.b16.start.end [1/1] (short) (narrow) %v831_v45, 16 }
 0x397   : > { %2372 = vxpose.xlu1.c.b16.start.end [1/1] (short) (narrow) %v834_v47, 16 }
 0x399   : > { %2356 = vxpose.xlu0.c.b16.start.end [1/1] (short) (narrow) %v833_v51, 16 }
 0x39b   : > { %2404 = vxpose.xlu1.c.b16.start.end [1/1] (short) (narrow) %v836_v53, 16 }
 0x39d   : > { %2388 = vxpose.xlu0.c.b16.start.end [1/1] (short) (narrow) %v835_v60, 16 }
 0x39f   : > { %2436 = vxpose.xlu1.c.b16.start.end [1/1] (short) (narrow) %v838_v63, 16 }
 0x3a1   : > { %2420 = vxpose.xlu0.c.b16.start.end [1/1] (short) (narrow) %v837_v0, 16 }
 0x3a5   : > { %2452 = vxpose.xlu0.c.b16.start.end [1/1] (short) (narrow) %v839_v55, 16 }
 0x3eb   : > { %v2220_v57 = vpop.trf.xlu0 }
 0x3ed   : > { %v2236_v62 = vpop.trf.xlu1 }
 0x3ef   : > { %v2252_v5 = vpop.trf.xlu0 }
 0x3f1   : > { %v2284_v2 = vpop.trf.xlu1 }
 0x3f2   : > { %v2469_v7 = vcombine.high %v2220_v57, %v2284_v2  ;;  %v2468_v17 = vcombine.low %v2220_v57, %v2284_v2 }
 0x3f3   : > { %v2268_v8 = vpop.trf.xlu0 }
 0x3f4   : > { %v2483_v10 = vrot.slane %v2469_v7, %v4643_v49  ;;  %v2476_v31 = vrot.slane %v2468_v17, %v4643_v49 }
 0x3f5   : > { %v2316_v9 = vpop.trf.xlu1 }
 0x3f6   : > { %v2485_v3 = vcombine.high %v2252_v5, %v2316_v9  ;;  %v2484_v18 = vcombine.low %v2252_v5, %v2316_v9 }
 0x3f7   : > { %v2300_v6 = vpop.trf.xlu0 }
 0x3f8   : > { %v2605_v11 = vcombine.high %v2236_v62, %v2300_v6  ;;  %v2499_v30 = vrot.slane %v2485_v3, %v4643_v49  ;;  %v2604_v22 = vcombine.low %v2236_v62, %v2300_v6  ;;  %v2492_v27 = vrot.slane %v2484_v18, %v4643_v49 }
 0x3f9   : > { %v2348_v12 = vpop.trf.xlu1 }
 0x3fa   : > { %v2548_v13 = vcombine.low %v2483_v10, %v2499_v30  ;;  %v2549_v14 = vcombine.high %v2483_v10, %v2499_v30  ;;  %v2619_v59 = vrot.slane %v2605_v11, %v4643_v49  ;;  %v2612_v24 = vrot.slane %v2604_v22, %v4643_v49 }
 0x3fb   : > { %v2332_v56 = vpop.trf.xlu0  ;;  %v2532_v25 = vcombine.low %v2476_v31, %v2492_v27  ;;  %v2533_v47 = vcombine.high %v2476_v31, %v2492_v27 }
 0x3fc   : > { %v2621_v1 = vcombine.high %v2268_v8, %v2332_v56  ;;  %v2620_v21 = vcombine.low %v2268_v8, %v2332_v56  ;;  %v2556_v4 = vrot.slane %v2548_v13, %v4649_v58  ;;  %v2563_v8 = vrot.slane %v2549_v14, %v4649_v58 }
 0x3fd   : > { %v2380_v15 = vpop.trf.xlu1  ;;  %v2540_v54 = vrot.slane %v2532_v25, %v4649_v58  ;;  %v2547_v22 = vrot.slane %v2533_v47, %v4649_v58 }
 0x3fe   : > { %v2635_v16 = vrot.slane %v2621_v1, %v4643_v49  ;;  %v2628_v26 = vrot.slane %v2620_v21, %v4643_v49 }
 0x3ff   : > { %v2364_v37 = vpop.trf.xlu0 }
 0x400   : > { %v2684_v38 = vcombine.low %v2619_v59, %v2635_v16  ;;  %v2685_v19 = vcombine.high %v2619_v59, %v2635_v16  ;;  %v2668_v50 = vcombine.low %v2612_v24, %v2628_v26  ;;  %v2669_v55 = vcombine.high %v2612_v24, %v2628_v26 }
 0x401   : > { %v2412_v23 = vpop.trf.xlu1 }
 0x402   : > { %v2500_v34 = vcombine.low %v2348_v12, %v2412_v23  ;;  %v2501_v29 = vcombine.high %v2348_v12, %v2412_v23  ;;  %v2676_v9 = vrot.slane %v2668_v50, %v4649_v58  ;;  %v2692_v56 = vrot.slane %v2684_v38, %v4649_v58 }
 0x403   : > { %v2396_v39 = vpop.trf.xlu0  ;;  %v2683_v1 = vrot.slane %v2669_v55, %v4649_v58  ;;  %v2699_v14 = vrot.slane %v2685_v19, %v4649_v58 }
 0x404   : > { %v2508_v36 = vrot.slane %v2500_v34, %v4643_v49  ;;  %v2515_v33 = vrot.slane %v2501_v29, %v4643_v49 }
 0x405   : > { %v2444_v20 = vpop.trf.xlu1 }
 0x406   : > { %v2516_v40 = vcombine.low %v2380_v15, %v2444_v20  ;;  %v2517_v41 = vcombine.high %v2380_v15, %v2444_v20 }
 0x407   : > { %v2428_v42 = vpop.trf.xlu0 }
 0x408   : > { %v2636_v32 = vcombine.low %v2364_v37, %v2428_v42  ;;  %v2637_v44 = vcombine.high %v2364_v37, %v2428_v42  ;;  %v2524_v45 = vrot.slane %v2516_v40, %v4643_v49  ;;  %v2531_v46 = vrot.slane %v2517_v41, %v4643_v49 }
 0x40a   : > { %v2564_v48 = vcombine.low %v2508_v36, %v2524_v45  ;;  %v2580_v51 = vcombine.low %v2515_v33, %v2531_v46  ;;  %v2581_v52 = vcombine.high %v2515_v33, %v2531_v46  ;;  %v2644_v60 = vrot.slane %v2636_v32, %v4643_v49 }
 0x40b   : > { %v2460_v53 = vpop.trf.xlu0  ;;  %v2651_v61 = vrot.slane %v2637_v44, %v4643_v49  ;;  %v2565_v57 = vcombine.high %v2508_v36, %v2524_v45 }
 0x40c   : > { %v2652_v63 = vcombine.low %v2396_v39, %v2460_v53  ;;  %v2653_v0 = vcombine.high %v2396_v39, %v2460_v53  ;;  %v2588_v62 = vrot.slane %v2580_v51, %v4649_v58  ;;  %v2572_v7 = vrot.slane %v2564_v48, %v4649_v58 }
 0x40d   : > { %v2595_v6 = vrot.slane %v2581_v52, %v4649_v58  ;;  %v2579_v59 = vrot.slane %v2565_v57, %v4649_v58 }
 0x40e   : > { %v2660_v5 = vrot.slane %v2652_v63, %v4643_v49  ;;  %v2667_v2 = vrot.slane %v2653_v0, %v4643_v49  ;;  %v4885_v3 = vcombine.low %v2556_v4, %v2588_v62  ;;  %v4887_v10 = vcombine.high %v2556_v4, %v2588_v62 }
 0x40f   : > { %v2596_v16 = vcombine.low %v2540_v54, %v2572_v7  ;;  %v2597_v18 = vcombine.high %v2540_v54, %v2572_v7  ;;  %v4897_v23 = vcombine.low %v2563_v8, %v2595_v6  ;;  %v4900_v29 = vcombine.high %v2563_v8, %v2595_v6 }
 0x410   : > { %v2700_v11 = vcombine.low %v2644_v60, %v2660_v5  ;;  %v2701_v30 = vcombine.high %v2644_v60, %v2660_v5  ;;  %v2716_v12 = vcombine.low %v2651_v61, %v2667_v2  ;;  %v2717_v13 = vcombine.high %v2651_v61, %v2667_v2 }
 0x411   : > { %v2744_v20 = vshrl.u32 %v2596_v16, 16  ;;  %v2598_v40 = vcombine.low %v2547_v22, %v2579_v59  ;;  %v2752_v41 = vshrl.u32 %v2597_v18, 16  ;;  %v2776_v26 = vshrl.u32 %v4885_v3, 16 }
 0x412   : > { %v2724_v15 = vrot.slane %v2716_v12, %v4649_v58  ;;  %v2708_v17 = vrot.slane %v2700_v11, %v4649_v58  ;;  %v2715_v37 = vrot.slane %v2701_v30, %v4649_v58  ;;  %v2731_v34 = vrot.slane %v2717_v13, %v4649_v58 }
 0x413   : > { %v2784_v44 = vshrl.u32 %v4887_v10, 16  ;;  %v2792_v48 = vshrl.u32 %v4897_v23, 16  ;;  %v2800_v55 = vshrl.u32 %v4900_v29, 16  ;;  %v2760_v5 = vshrl.u32 %v2598_v40, 16 }
 0x414   : > { %v2732_v38 = vcombine.low %v2676_v9, %v2708_v17  ;;  %v2733_v31 = vcombine.high %v2676_v9, %v2708_v17  ;;  %v4903_v27 = vcombine.low %v2692_v56, %v2724_v15  ;;  %v4905_v19 = vcombine.high %v2692_v56, %v2724_v15 }
 0x415   : > { %v4907_v21 = vcombine.low %v2699_v14, %v2731_v34  ;;  %v2734_v25 = vcombine.low %v2683_v1, %v2715_v37  ;;  %v4923_v53 = vcombine.high %v2699_v14, %v2731_v34  ;;  %v2735_v61 = vcombine.high %v2683_v1, %v2715_v37 }
 0x416   : > { %v2742_v39 = vpack.i.b16 %v2732_v38, %v2596_v16  ;;  %v2745_v36 = vshrl.u32 %v2732_v38, 16  ;;  %v2753_v24 = vshrl.u32 %v2733_v31, 16  ;;  %v2774_v42 = vpack.i.b16 %v4903_v27, %v4885_v3 }
 0x417   : > { %v2777_v32 = vshrl.u32 %v4903_v27, 16  ;;  %v2750_v45 = vpack.i.b16 %v2733_v31, %v2597_v18  ;;  %v2782_v46 = vpack.i.b16 %v4905_v19, %v4887_v10  ;;  %v2785_v47 = vshrl.u32 %v4905_v19, 16 }
 0x418   : > { %2804 = vxpose.xlu1.c.b16.start.end [1/1] (short) (narrow) %v2742_v39, 16  ;;  %v2746_v33 = vpack.i.b16 %v2745_v36, %v2744_v20  ;;  %v2790_v51 = vpack.i.b16 %v4907_v21, %v4897_v23  ;;  %v2793_v52 = vshrl.u32 %v4907_v21, 16  ;;  %v2754_v54 = vpack.i.b16 %v2753_v24, %v2752_v41 }
 0x419   : > { %v4918_v50 = vpack.i.b16 %v2777_v32, %v2776_v26  ;;  %v2761_v60 = vshrl.u32 %v2734_v25, 16  ;;  %v4925_v63 = vpack.i.b16 %v2785_v47, %v2784_v44  ;;  %v2798_v4 = vpack.i.b16 %v4923_v53, %v4900_v29 }
 0x41a   : > { %2820 = vxpose.xlu0.c.b16.start.end [1/1] (short) (narrow) %v2746_v33, 16  ;;  %v4927_v0 = vpack.i.b16 %v2793_v52, %v2792_v48  ;;  %v2801_v57 = vshrl.u32 %v4923_v53, 16  ;;  %v2758_v62 = vpack.i.b16 %v2734_v25, %v2598_v40  ;;  %v2599_v2 = vcombine.high %v2547_v22, %v2579_v59 }
 0x41b   : > { %v2762_v8 = vpack.i.b16 %v2761_v60, %v2760_v5  ;;  %v2769_v9 = vshrl.u32 %v2735_v61, 16  ;;  %v2105_v12 = vand.u32 127, %v345_v35  ;;  %v2103_v13 = vadd.s32 8, %v4638_v43 }
 0x41c   : > { %2836 = vxpose.xlu1.c.b16.start.end [1/1] (short) (narrow) %v2750_v45, 16  ;;  %v4933_v7 = vpack.i.b16 %v2801_v57, %v2800_v55  ;;  %v2766_v6 = vpack.i.b16 %v2735_v61, %v2599_v2  ;;  %v2768_v11 = vshrl.u32 %v2599_v2, 16 }
 0x41d   : > { %vm2106_vm3 = vcmp.ge.s32.totalorder %v4638_v43, %v2105_v12  ;;  %vm2107_vm4 = vcmp.ge.s32.totalorder %v2103_v13, %v2105_v12 }
 0x41e   : > { %2852 = vxpose.xlu0.c.b16.start.end [1/1] (short) (narrow) %v2754_v54, 16  ;;  %v2770_v30 = vpack.i.b16 %v2769_v9, %v2768_v11 }
 0x420   : > { %2868 = vxpose.xlu1.c.b16.start.end [1/1] (short) (narrow) %v2758_v62, 16 }
 0x422   : > { %2884 = vxpose.xlu0.c.b16.start.end [1/1] (short) (narrow) %v2762_v8, 16 }
 0x424   : > { %2900 = vxpose.xlu1.c.b16.start.end [1/1] (short) (narrow) %v2766_v6, 16 }
 0x426   : > { %2916 = vxpose.xlu0.c.b16.start.end [1/1] (short) (narrow) %v2770_v30, 16 }
 0x444   : > { %v1954_v56 = vpop.f32.mrb[4].mxu0 }
 0x445   : > { %v2093_v1 = vmul.f32 0.25, %v1954_v56  ;;  %v4032_v59 = vpop.f32.mrb[5].mxu0 }
 0x446   : > { %v1957_v14 = vpop.f32.mrb[6].mxu0  ;;  %v1998_v15 = vpop.f32.mrb[0].mxu1 }
 0x447   : > { %v2094_v16 = vmul.f32 0.25, %v1957_v14  ;;  %v2095_v17 = vmul.f32 0.25, %v1998_v15  ;;  %v4033_v18 = vpop.f32.mrb[7].mxu0  ;;  %v4038_v37 = vpop.f32.mrb[1].mxu1  ;;  %v4940_v34 = vsel %vm2106_vm3, %v2093_v1, -1e+30 }
 0x448   : > { %v2001_v38 = vpop.f32.mrb[2].mxu1  ;;  %v2120_v35 = vsel %vm1916_vm2, %v4940_v34, -inf }
 0x449   : > { %v2096_v31 = vmul.f32 0.25, %v2001_v38  ;;  %v4039_v22 = vpop.f32.mrb[3].mxu1  ;;  %2121 = vmax.xlane.f32.xlu1 %v2120_v35  ;;  %v4945_v39 = vsel %vm2107_vm4, %v2094_v16, -1e+30  ;;  %v4949_v20 = vsel %vm2106_vm3, %v2095_v17, -1e+30 }
 0x44a   : > { %v2123_v36 = vsel %vm1916_vm2, %v4945_v39, -inf  ;;  %v2126_v24 = vsel %vm1916_vm2, %v4949_v20, -inf }
 0x44b   : > { %2124 = vmax.xlane.f32.xlu0 %v2123_v36  ;;  %v4954_v40 = vsel %vm2107_vm4, %v2096_v31, -1e+30 }
 0x44c   : > { %v2086_v41 = vpop.f32.mrb[8].mxu0  ;;  %v2129_v44 = vsel %vm1916_vm2, %v4954_v40, -inf }
 0x44d   : > { %v2099_v25 = vmul.f32 0.25, %v2086_v41  ;;  %2127 = vmax.xlane.f32.xlu1 %v2126_v24  ;;  %v4050_v26 = vpop.f32.mrb[9].mxu0 }
 0x44e   : > { %v2042_v33 = vpop.f32.mrb[4].mxu1  ;;  %v2089_v32 = vpop.f32.mrb[10].mxu0 }
 0x44f   : > { %v2097_v45 = vmul.f32 0.25, %v2042_v33  ;;  %v2100_v47 = vmul.f32 0.25, %v2089_v32  ;;  %v4044_v48 = vpop.f32.mrb[5].mxu1  ;;  %2130 = vmax.xlane.f32.xlu0 %v2129_v44  ;;  %v4051_v52 = vpop.f32.mrb[11].mxu0  ;;  %v2118_v54 = vsel %vm2106_vm3, %v2099_v25, -1e+30 }
 0x450   : > { %v2045_v60 = vpop.f32.mrb[6].mxu1  ;;  %v2138_v61 = vsel %vm1916_vm2, %v2118_v54, -inf }
 0x451   : > { %v2098_v55 = vmul.f32 0.25, %v2045_v60  ;;  %v4045_v57 = vpop.f32.mrb[7].mxu1  ;;  %2139 = vmax.xlane.f32.xlu1 %v2138_v61  ;;  %v2119_v62 = vsel %vm2107_vm4, %v2100_v47, -1e+30  ;;  %v2116_v5 = vsel %vm2106_vm3, %v2097_v45, -1e+30 }
 0x452   : > { %v2141_v2 = vsel %vm1916_vm2, %v2119_v62, -inf  ;;  %v2132_v9 = vsel %vm1916_vm2, %v2116_v5, -inf }
 0x453   : > { %2142 = vmax.xlane.f32.xlu0 %v2141_v2  ;;  %v2117_v8 = vsel %vm2107_vm4, %v2098_v55, -1e+30 }
 0x454   : > { %v2135_v6 = vsel %vm1916_vm2, %v2117_v8, -inf }
 0x455   : > { %2133 = vmax.xlane.f32.xlu1 %v2132_v9 }
 0x457   : > { %2136 = vmax.xlane.f32.xlu0 %v2135_v6 }
 0x47e   : > { %v2812_v11 = vpop.trf.xlu1 }
 0x480   : > { %v2828_v30 = vpop.trf.xlu0 }
 0x482   : > { %2932 = vxpose.xlu1.c.b16.start.end [1/1] (short) (narrow) %v2774_v42, 16  ;;  %v2844_v56 = vpop.trf.xlu1 }
 0x484   : > { %2948 = vxpose.xlu0.c.b16.start.end [1/1] (short) (narrow) %v4918_v50, 16  ;;  %v2860_v43 = vpop.trf.xlu0 }
 0x486   : > { %2964 = vxpose.xlu1.c.b16.start.end [1/1] (short) (narrow) %v2782_v46, 16  ;;  %v2876_v12 = vpop.trf.xlu1 }
 0x487   : > { %v3060_v13 = vcombine.low %v2812_v11, %v2876_v12 }
 0x488   : > { %2980 = vxpose.xlu0.c.b16.start.end [1/1] (short) (narrow) %v4925_v63, 16  ;;  %v2892_v1 = vpop.trf.xlu0 }
 0x489   : > { %v3110_v59 = vcombine.low %v2828_v30, %v2892_v1  ;;  %v4982_v27 = vrot.slane %v3060_v13, %v4643_v49 }
 0x48a   : > { %2996 = vxpose.xlu1.c.b16.start.end [1/1] (short) (narrow) %v2790_v51, 16  ;;  %v2908_v3 = vpop.trf.xlu1 }
 0x48b   : > { %v3068_v42 = vcombine.low %v2844_v56, %v2908_v3  ;;  %v4986_v10 = vrot.slane %v3110_v59, %v4643_v49 }
 0x48c   : > { %3012 = vxpose.xlu0.c.b16.start.end [1/1] (short) (narrow) %v4927_v0, 16  ;;  %v2924_v50 = vpop.trf.xlu0 }
 0x48d   : > { %v3118_v19 = vcombine.low %v2860_v43, %v2924_v50  ;;  %v4989_v46 = vrot.slane %v3068_v42, %v4643_v49 }
 0x48f   : > { %v4992_v63 = vrot.slane %v3118_v19, %v4643_v49  ;;  %v3092_v23 = vcombine.low %v4982_v27, %v4989_v46 }
 0x491   : > { %v3142_v21 = vcombine.low %v4986_v10, %v4992_v63 }
 0x4d6   : > { %v2122_v51 = vpop.xlane.xlu1 %2121 }
 0x4d7   : > { %v2144_v0 = vsub.f32 %v4940_v34, %v2122_v51 }
 0x4d8   : > { %v2125_v14 = vpop.xlane.xlu0 %2124 }
 0x4d9   : > { %v2152_v15 = vmul.f32 1.442695, %v2144_v0  ;;  %v2145_v16 = vsub.f32 %v4945_v39, %v2125_v14 }
 0x4da   : > { %v2128_v17 = vpop.xlane.xlu1 %2127 }
 0x4db   : > { %4188 = vpow2.f32 %v2152_v15  ;;  %v2154_v18 = vmul.f32 1.442695, %v2145_v16  ;;  %v2146_v37 = vsub.f32 %v4949_v20, %v2128_v17 }
 0x4dc   : > { %v2131_v38 = vpop.xlane.xlu0 %2130 }
 0x4dd   : > { %4190 = vpow2.f32 %v2154_v18  ;;  %v2156_v35 = vmul.f32 1.442695, %v2146_v37  ;;  %v2147_v31 = vsub.f32 %v4954_v40, %v2131_v38 }
 0x4de   : > { %v2140_v22 = vpop.xlane.xlu1 %2139 }
 0x4df   : > { %4192 = vpow2.f32 %v2156_v35  ;;  %v2158_v36 = vmul.f32 1.442695, %v2147_v31  ;;  %v2150_v41 = vsub.f32 %v2118_v54, %v2140_v22 }
 0x4e0   : > { %v2143_v24 = vpop.xlane.xlu0 %2142 }
 0x4e1   : > { %4194 = vpow2.f32 %v2158_v36  ;;  %v2164_v34 = vmul.f32 1.442695, %v2150_v41  ;;  %v2151_v25 = vsub.f32 %v2119_v62, %v2143_v24 }
 0x4e2   : > { %v2134_v26 = vpop.xlane.xlu1 %2133 }
 0x4e3   : > { %4196 = vpow2.f32 %v2164_v34  ;;  %v2166_v39 = vmul.f32 1.442695, %v2151_v25  ;;  %v2148_v33 = vsub.f32 %v2116_v5, %v2134_v26 }
 0x4e4   : > { %v2137_v32 = vpop.xlane.xlu0 %2136 }
 0x4e5   : > { %v4189_v44 = vpop.eup %4188  ;;  %4198 = vpow2.f32 %v2166_v39  ;;  %v2160_v20 = vmul.f32 1.442695, %v2148_v33  ;;  %v2149_v45 = vsub.f32 %v2117_v8, %v2137_v32 }
 0x4e6   : > { %v2168_v47 = vsel %vm1916_vm2, %v4189_v44, 0.0 }
 0x4e7   : > { %v4191_v40 = vpop.eup %4190  ;;  %4200 = vpow2.f32 %v2160_v20  ;;  %v2162_v48 = vmul.f32 1.442695, %v2149_v45  ;;  %2169 = vadd.xlane.f32.xlu1 %v2168_v47 }
 0x4e8   : > { %v2171_v52 = vsel %vm1916_vm2, %v4191_v40, 0.0  ;;  %v2940_v30 = vpop.trf.xlu1 }
 0x4e9   : > { %v4193_v54 = vpop.eup %4192  ;;  %4202 = vpow2.f32 %v2162_v48  ;;  %2172 = vadd.xlane.f32.xlu0 %v2171_v52  ;;  %v3099_v48 = vrot.slane %v3092_v23, %v4649_v58 }
 0x4ea   : > { %v2174_v60 = vsel %vm1916_vm2, %v4193_v54, 0.0  ;;  %v2956_v56 = vpop.trf.xlu0 }
 0x4eb   : > { %v4195_v61 = vpop.eup %4194  ;;  %2175 = vadd.xlane.f32.xlu1 %v2174_v60  ;;  %v3149_v60 = vrot.slane %v3142_v21, %v4649_v58 }
 0x4ec   : > { %v2177_v55 = vsel %vm1916_vm2, %v4195_v61, 0.0  ;;  %v2972_v43 = vpop.trf.xlu1 }
 0x4ed   : > { %v5006_v57 = vpop.eup %4196  ;;  %2178 = vadd.xlane.f32.xlu0 %v2177_v55 }
 0x4ee   : > { %v2186_v62 = vsel %vm1916_vm2, %v5006_v57, 0.0  ;;  %v2988_v12 = vpop.trf.xlu0 }
 0x4ef   : > { %v5010_v5 = vpop.eup %4198  ;;  %2187 = vadd.xlane.f32.xlu1 %v2186_v62 }
 0x4f0   : > { %v2189_v2 = vsel %vm1916_vm2, %v5010_v5, 0.0  ;;  %v3004_v13 = vpop.trf.xlu1 }
 0x4f1   : > { %v5014_v8 = vpop.eup %4200  ;;  %2190 = vadd.xlane.f32.xlu0 %v2189_v2  ;;  %v3076_v18 = vcombine.low %v2940_v30, %v3004_v13 }
 0x4f2   : > { %v2180_v9 = vsel %vm1916_vm2, %v5014_v8, 0.0  ;;  %v3020_v1 = vpop.trf.xlu0 }
 0x4f3   : > { %v5018_v6 = vpop.eup %4202  ;;  %2181 = vadd.xlane.f32.xlu1 %v2180_v9  ;;  %v3126_v22 = vcombine.low %v2956_v56, %v3020_v1  ;;  %v3083_v34 = vrot.slane %v3076_v18, %v4643_v49  ;;  %v3793_v18 = vld [vmem:[#allocation7] sm:$0xff] }
 0x4f4   : > { %v2183_v11 = vsel %vm1916_vm2, %v5018_v6, 0.0 }
 0x4f5   : > { %2184 = vadd.xlane.f32.xlu0 %v2183_v11 }
 0x520   : > { %3028 = vxpose.xlu1.c.b16.start.end [1/1] (short) (narrow) %v2798_v4, 16 }
 0x522   : > { %3044 = vxpose.xlu0.c.b16.start.end [1/1] (short) (narrow) %v4933_v7, 16 }
 0x574   : > { %v2170_v59 = vpop.xlane.xlu1 %2169 }
 0x575   : > { %4204 = vrcp.f32 %v2170_v59 }
 0x576   : > { %v2173_v3 = vpop.xlane.xlu0 %2172 }
 0x577   : > { %4206 = vrcp.f32 %v2173_v3 }
 0x578   : > { %v2176_v42 = vpop.xlane.xlu1 %2175 }
 0x579   : > { %4208 = vrcp.f32 %v2176_v42 }
 0x57a   : > { %v2179_v50 = vpop.xlane.xlu0 %2178 }
 0x57b   : > { %4210 = vrcp.f32 %v2179_v50 }
 0x57c   : > { %v2188_v19 = vpop.xlane.xlu1 %2187 }
 0x57d   : > { %4212 = vrcp.f32 %v2188_v19 }
 0x57e   : > { %v2191_v51 = vpop.xlane.xlu0 %2190 }
 0x57f   : > { %v4205_v29 = vpop.eup %4204  ;;  %4214 = vrcp.f32 %v2191_v51 }
 0x580   : > { %v2182_v53 = vpop.xlane.xlu1 %2181  ;;  %v2200_v0 = vmul.f32 %v4205_v29, %v4189_v44  ;;  %v3133_v44 = vrot.slane %v3126_v22, %v4643_v49 }
 0x581   : > { %v4207_v4 = vpop.eup %4206  ;;  %4216 = vrcp.f32 %v2182_v53 }
 0x582   : > { %v2185_v7 = vpop.xlane.xlu0 %2184  ;;  %v2201_v14 = vmul.f32 %v4207_v4, %v4191_v40 }
 0x583   : > { %v4209_v15 = vpop.eup %4208  ;;  %4218 = vrcp.f32 %v2185_v7 }
 0x584   : > { %v2208_v16 = vpack.c.bf16 %v2201_v14, %v2200_v0  ;;  %v2202_v35 = vmul.f32 %v4209_v15, %v4193_v54 }
 0x585   : > { %v4211_v17 = vpop.eup %4210 }
 0x586   : > { %v3036_v37 = vpop.trf.xlu1  ;;  %v3176_v38 = vsel %vm1916_vm2, %v2208_v16, 0  ;;  %v2203_v31 = vmul.f32 %v4211_v17, %v4195_v61 }
 0x587   : > { %v3084_v36 = vcombine.low %v2972_v43, %v3036_v37  ;;  %4053 = vmatpush3.bf16.xpose.msra.mxu1 %v3176_v38  ;;  %v4213_v39 = vpop.eup %4212  ;;  %v3794_v37 = vld [vmem:[#allocation7 + $0x8] sm:$0xff]  ;;  %v3795_v38 = vld [vmem:[#allocation7 + $0x10] sm:$0xff] }
 0x588   : > { %v3052_v41 = vpop.trf.xlu0  ;;  %v2209_v24 = vpack.c.bf16 %v2203_v31, %v2202_v35  ;;  %4064 = vmatprep.subr.bf16.mxu1 %v4386_v28  ;;  %v2206_v27 = vmul.f32 %v4213_v39, %v5006_v57  ;;  %v3801_v35 = vpack.c.bf16 %v3794_v37, %v3793_v18  ;;  %v3796_v31 = vld [vmem:[#allocation7 + $0x18] sm:$0xff] }
 0x589   : > { %v3091_v25 = vrot.slane %v3084_v36, %v4643_v49  ;;  %v3134_v26 = vcombine.low %v2988_v12, %v3052_v41  ;;  %v4215_v32 = vpop.eup %4214  ;;  %v3802_v22 = vpack.c.bf16 %v3796_v31, %v3795_v38 }
 0x58a   : > { %v3223_v33 = vsel %vm1916_vm2, %v2209_v24, 0  ;;  %v2207_v55 = vmul.f32 %v4215_v32, %v5010_v5 }
 0x58b   : > { %v3100_v20 = vcombine.low %v3083_v34, %v3091_v25  ;;  %v3141_v45 = vrot.slane %v3134_v26, %v4643_v49  ;;  %4059 = vmatpush3.bf16.xpose.msra.mxu0 %v3223_v33  ;;  %v4217_v47 = vpop.eup %4216 }
 0x58c   : > { %4070 = vmatprep.subr.bf16.mxu0 %v4386_v28  ;;  %v2204_v11 = vmul.f32 %v4217_v47, %v5014_v8  ;;  %v2211_v12 = vpack.c.bf16 %v2207_v55, %v2206_v27 }
 0x58d   : > { %v4219_v40 = vpop.eup %4218  ;;  %v3107_v52 = vrot.slane %v3100_v20, %v4649_v58  ;;  %v3150_v54 = vcombine.low %v3133_v44, %v3141_v45 }
 0x58e   : > { %v2205_v61 = vmul.f32 %v4219_v40, %v5018_v6  ;;  %v3317_v57 = vsel %vm1916_vm2, %v2211_v12, 0 }
 0x58f   : > { %v3108_v62 = vcombine.low %v3099_v48, %v3107_v52  ;;  %v3109_v2 = vcombine.high %v3099_v48, %v3107_v52  ;;  %v3157_v9 = vrot.slane %v3150_v54, %v4649_v58 }
 0x590   : > { %v2210_v30 = vpack.c.bf16 %v2205_v61, %v2204_v11 }
 0x591   : > { %v3158_v46 = vcombine.low %v3149_v60, %v3157_v9  ;;  %v3159_v23 = vcombine.high %v3149_v60, %v3157_v9  ;;  %v3163_v56 = vshrl.u32 %v3108_v62, 16  ;;  %v3169_v43 = vshrl.u32 %v3109_v2, 16 }
 0x592   : > { %v3270_v5 = vsel %vm1916_vm2, %v2210_v30, 0 }
 0x593   : > { %v3162_v10 = vpack.i.b16 %v3158_v46, %v3108_v62  ;;  %v3164_v63 = vshrl.u32 %v3158_v46, 16  ;;  %v3168_v21 = vpack.i.b16 %v3159_v23, %v3109_v2  ;;  %v3170_v6 = vshrl.u32 %v3159_v23, 16 }
 0x595   : > { %4055 = vmatmul.mubr.msk.bf16.vlgmr.msra.gmra.mrb[8].mxu1 %vm1916_vm2, %v3162_v10  ;;  %v3165_v13 = vpack.i.b16 %v3164_v63, %v3163_v56  ;;  %v3171_v1 = vpack.i.b16 %v3170_v6, %v3169_v43 }
 0x596   : > { %4065 = vmatpush3.bf16.xpose.msra.mxu1 %v3270_v5  ;;  %4066 = vmatprep.mubr.msk.bf16.mxu1 %vm4393_vm1, %v4386_v28 }
 0x597   : > { %4061 = vmatmul.mubr.msk.bf16.vlgmr.msra.gmra.mrb[12].mxu0 %vm1916_vm2, %v3165_v13  ;;  %4076 = vmatprep.subr.bf16.mxu1 %v4386_v28 }
 0x598   : > { %4071 = vmatpush3.bf16.xpose.msra.mxu0 %v3317_v57  ;;  %4072 = vmatprep.mubr.msk.bf16.mxu0 %vm4393_vm1, %v4386_v28 }
 0x59d   : > { %4067 = vmatmul.mubr.msk.bf16.vlgmr.msra.gmra.mrb[12].mxu1 %vm1916_vm2, %v3168_v21 }
 0x59e   : > { %4084 = vmatprep.mubr.msk.bf16.mxu1 %vm4393_vm1, %v4386_v28  ;;  %4077 = vmatpush3.bf16.msra.mxu1 %v3801_v35 }
 0x59f   : > { %4073 = vmatmul.mubr.msk.bf16.vlgmr.msra.gmra.mrb[16].mxu0 %vm1916_vm2, %v3171_v1  ;;  %4078 = vmatprep.subr.bf16.mxu1 %v4386_v28 }
 0x5a2   : > { %4079 = vmatpush3.bf16.msra.mxu1 %v3802_v22 }
 0x5a3   : > { %4080 = vmatprep.subr.bf16.mxu1 %v4386_v28 }
 0x668   : > { %v3212_v8 = vpop.f32.mrb[8].mxu1 }
 0x669   : > { %3360 = vxpose.xlu1.b32.start [1/2] (short) (narrow) %v3212_v8, 16  ;;  %v4056_v59 = vpop.f32.mrb[9].mxu1 }
 0x66a   : > { %v3215_v3 = vpop.f32.mrb[10].mxu1  ;;  %v3259_v42 = vpop.f32.mrb[12].mxu0 }
 0x66b   : > { %v4057_v50 = vpop.f32.mrb[11].mxu1  ;;  %3392 = vxpose.xlu0.b32.start [1/2] (short) (narrow) %v3259_v42, 16  ;;  %v4062_v19 = vpop.f32.mrb[13].mxu0 }
 0x66c   : > { %v3262_v51 = vpop.f32.mrb[14].mxu0 }
 0x66d   : > { %3361 = vxpose.xlu1.b32.end [2/2] (short) (narrow) %v3215_v3, 16  ;;  %v4063_v29 = vpop.f32.mrb[15].mxu0 }
 0x66f   : > { %3393 = vxpose.xlu0.b32.end [2/2] (short) (narrow) %v3262_v51, 16 }
 0x670   : > { %v3306_v53 = vpop.f32.mrb[12].mxu1 }
 0x671   : > { %v4068_v4 = vpop.f32.mrb[13].mxu1 }
 0x672   : > { %v3309_v7 = vpop.f32.mrb[14].mxu1  ;;  %v3353_v0 = vpop.f32.mrb[16].mxu0 }
 0x673   : > { %v4069_v14 = vpop.f32.mrb[15].mxu1  ;;  %3424 = vxpose.xlu0.b32.start [1/2] (short) (narrow) %v3306_v53, 16  ;;  %3456 = vxpose.xlu1.b32.start [1/2] (short) (narrow) %v3353_v0, 16  ;;  %v4074_v15 = vpop.f32.mrb[17].mxu0 }
 0x674   : > { %v3356_v16 = vpop.f32.mrb[18].mxu0 }
 0x675   : > { %v4075_v17 = vpop.f32.mrb[19].mxu0 }
 0x677   : > { %3425 = vxpose.xlu0.b32.end [2/2] (short) (narrow) %v3309_v7, 16  ;;  %3457 = vxpose.xlu1.b32.end [2/2] (short) (narrow) %v3356_v16, 16 }
 0x6e9   : > { %v3376_v36 = vpop.trf.xlu1 }
 0x6eb   : > { %v3408_v41 = vpop.trf.xlu0 }
 0x6ed   : > { %v3377_v24 = vpop.trf.xlu1 }
 0x6ef   : > { %v3409_v34 = vpop.trf.xlu0 }
 0x6f3   : > { %v3440_v25 = vpop.trf.xlu0  ;;  %v3472_v26 = vpop.trf.xlu1 }
 0x6f4   : > { %v3488_v39 = vcombine.low %v3376_v36, %v3440_v25  ;;  %v3489_v33 = vcombine.high %v3376_v36, %v3440_v25  ;;  %v3504_v32 = vcombine.low %v3408_v41, %v3472_v26  ;;  %v3505_v44 = vcombine.high %v3408_v41, %v3472_v26  ;;  %v3797_v41 = vld [vmem:[#allocation7 + $0x20] sm:$0xff] }
 0x6f6   : > { %v3496_v20 = vrot.slane %v3488_v39, %v4643_v49  ;;  %v3503_v45 = vrot.slane %v3489_v33, %v4643_v49  ;;  %v3512_v47 = vrot.slane %v3504_v32, %v4643_v49  ;;  %v3519_v40 = vrot.slane %v3505_v44, %v4643_v49 }
 0x6f7   : > { %v3441_v48 = vpop.trf.xlu0  ;;  %v3473_v52 = vpop.trf.xlu1 }
 0x6f8   : > { %v3520_v54 = vcombine.low %v3496_v20, %v3512_v47  ;;  %v3521_v60 = vcombine.high %v3496_v20, %v3512_v47  ;;  %v3536_v61 = vcombine.low %v3503_v45, %v3519_v40  ;;  %v3537_v55 = vcombine.high %v3503_v45, %v3519_v40 }
 0x6f9   : > { %v3556_v62 = vcombine.low %v3377_v24, %v3441_v48  ;;  %v3557_v2 = vcombine.high %v3377_v24, %v3441_v48  ;;  %v3572_v9 = vcombine.low %v3409_v34, %v3473_v52  ;;  %v3573_v11 = vcombine.high %v3409_v34, %v3473_v52  ;;  %v3798_v24 = vld [vmem:[#allocation7 + $0x28] sm:$0xff]  ;;  %v3799_v48 = vld [vmem:[#allocation7 + $0x30] sm:$0xff]  ;;  %v3800_v52 = vld [vmem:[#allocation7 + $0x38] sm:$0xff] }
 0x6fa   : > { %v3528_v27 = vrot.slane %v3520_v54, %v4649_v58  ;;  %v3535_v46 = vrot.slane %v3521_v60, %v4649_v58  ;;  %v3544_v23 = vrot.slane %v3536_v61, %v4649_v58  ;;  %v3551_v30 = vrot.slane %v3537_v55, %v4649_v58 }
 0x6fb   : > { %v3564_v56 = vrot.slane %v3556_v62, %v4643_v49  ;;  %v3571_v43 = vrot.slane %v3557_v2, %v4643_v49  ;;  %v3580_v12 = vrot.slane %v3572_v9, %v4643_v49  ;;  %v3587_v10 = vrot.slane %v3573_v11, %v4643_v49 }
 0x6fc   : > { %v3624_v63 = vcombine.low %v3528_v27, %v3535_v46  ;;  %v3994_v21 = vcombine.high %v3528_v27, %v3535_v46  ;;  %v3640_v6 = vcombine.low %v3544_v23, %v3551_v30  ;;  %v3995_v5 = vcombine.high %v3544_v23, %v3551_v30 }
 0x6fd   : > { %v3588_v13 = vcombine.low %v3564_v56, %v3580_v12  ;;  %v3589_v1 = vcombine.high %v3564_v56, %v3580_v12  ;;  %v3604_v57 = vcombine.low %v3571_v43, %v3587_v10  ;;  %v3605_v8 = vcombine.high %v3571_v43, %v3587_v10 }
 0x6fe   : > { %v3631_v59 = vrot.slane %v3624_v63, %v4643_v49  ;;  %v3639_v3 = vrot.slane %v3994_v21, %v4643_v49  ;;  %v3647_v42 = vrot.slane %v3640_v6, %v4643_v49  ;;  %v3655_v50 = vrot.slane %v3995_v5, %v4643_v49 }
 0x6ff   : > { %v3596_v19 = vrot.slane %v3588_v13, %v4649_v58  ;;  %v3603_v51 = vrot.slane %v3589_v1, %v4649_v58  ;;  %v3612_v29 = vrot.slane %v3604_v57, %v4649_v58  ;;  %v3619_v53 = vrot.slane %v3605_v8, %v4649_v58 }
 0x700   : > { %v3657_v4 = vcombine.high %v3631_v59, %v3639_v3  ;;  %v3673_v7 = vcombine.high %v3647_v42, %v3655_v50  ;;  %v3656_v0 = vcombine.low %v3631_v59, %v3639_v3  ;;  %v3672_v14 = vcombine.low %v3647_v42, %v3655_v50  ;;  %v3998_v3 = vld [vmem:[%s5159_s3] ss:$0 sm:$0xff] }
 0x701   : > { %v3692_v15 = vcombine.low %v3596_v19, %v3603_v51  ;;  %v3996_v16 = vcombine.high %v3596_v19, %v3603_v51  ;;  %v3708_v17 = vcombine.low %v3612_v29, %v3619_v53  ;;  %v3997_v18 = vcombine.high %v3612_v29, %v3619_v53 }
 0x702   : > { %v3664_v37 = vrot.slane %v3656_v0, %v4649_v58  ;;  %v3680_v38 = vrot.slane %v3672_v14, %v4649_v58  ;;  %v3671_v34 = vrot.slane %v3657_v4, %v4649_v58  ;;  %v3687_v25 = vrot.slane %v3673_v7, %v4649_v58 }
 0x703   : > { %v3699_v35 = vrot.slane %v3692_v15, %v4643_v49  ;;  %v3707_v31 = vrot.slane %v3996_v16, %v4643_v49  ;;  %v3715_v22 = vrot.slane %v3708_v17, %v4643_v49  ;;  %v3723_v36 = vrot.slane %v3997_v18, %v4643_v49 }
 0x704   : > { %v3688_v26 = vcombine.low %v3664_v37, %v3680_v38  ;;  %v3803_v20 = vpack.c.bf16 %v3798_v24, %v3797_v41  ;;  %v3690_v54 = vcombine.low %v3671_v34, %v3687_v25  ;;  %v3804_v60 = vpack.c.bf16 %v3800_v52, %v3799_v48 }
 0x705   : > { %v3725_v39 = vcombine.high %v3699_v35, %v3707_v31  ;;  %v3741_v33 = vcombine.high %v3715_v22, %v3723_v36  ;;  %v3724_v32 = vcombine.low %v3699_v35, %v3707_v31  ;;  %v3740_v44 = vcombine.low %v3715_v22, %v3723_v36 }
 0x706   : > { %4081 = vmatpush3.bf16.msra.mxu1 %v3803_v20  ;;  %v3689_v55 = vcombine.high %v3664_v37, %v3680_v38 }
 0x707   : > { %v3739_v45 = vrot.slane %v3725_v39, %v4649_v58  ;;  %v3755_v47 = vrot.slane %v3741_v33, %v4649_v58  ;;  %v3732_v40 = vrot.slane %v3724_v32, %v4649_v58  ;;  %v3748_v49 = vrot.slane %v3740_v44, %v4649_v58  ;;  %4082 = vmatprep.subr.bf16.mxu1 %v4386_v28 }
 0x708   : > { %v3691_v58 = vcombine.high %v3671_v34, %v3687_v25 }
 0x709   : > { %v3758_v61 = vcombine.low %v3739_v45, %v3755_v47  ;;  %v3757_v62 = vcombine.high %v3732_v40, %v3748_v49  ;;  %v3756_v2 = vcombine.low %v3732_v40, %v3748_v49  ;;  %v3759_v27 = vcombine.high %v3739_v45, %v3755_v47 }
 0x70a   : > { %4083 = vmatpush3.bf16.msra.mxu1 %v3804_v60 }
 0x70b   : > { %v4178_v9 = vpack.i.bf16 %v3758_v61, %v3690_v54  ;;  %v4173_v11 = vpack.i.bf16 %v3757_v62, %v3689_v55  ;;  %v4183_v46 = vpack.i.bf16 %v3759_v27, %v3691_v58 }
 0x70d   : > { %4179 = vrot.lane.b32.xlu1 %v4178_v9, %s4394_s30  ;;  %4174 = vrot.lane.b32.xlu0 %v4173_v11, %s4395_s6 }
 0x711   : > { %4184 = vrot.lane.b32.xlu1 %v4183_v46, %s4396_s9 }
 0x77f   : > { %v4180_v23 = vpop.permute.xlu1 %4179  ;;  %v4175_v30 = vpop.permute.xlu0 %4174 }
 0x780   : > { %v4177_v56 = vunpack.i.h.bf16 %v4175_v30  ;;  %v4176_v43 = vunpack.i.l.bf16 %v4175_v30  ;;  %v4182_v12 = vunpack.i.h.bf16 %v4180_v23  ;;  %v4181_v10 = vunpack.i.l.bf16 %v4180_v23 }
 0x782   : > { %v3784_v28 = vsel %vm1916_vm2, %v3688_v26, %v4176_v43  ;;  %v3785_v63 = vsel %vm1916_vm2, %v3756_v2, %v4177_v56 }
 0x783   : > { %v4185_v21 = vpop.permute.xlu1 %4184  ;;  %v3787_v13 = vsel %vm3786_vm5, %v3784_v28, %v4181_v10  ;;  %v3788_v1 = vsel %vm3786_vm5, %v3785_v63, %v4182_v12 }
 0x784   : > { %v4187_v6 = vunpack.i.h.bf16 %v4185_v21  ;;  %v4186_v5 = vunpack.i.l.bf16 %v4185_v21 }
 0x786   : > { %v3790_v57 = vsel %vm3789_vm6, %v3787_v13, %v4186_v5  ;;  %v3791_v8 = vsel %vm3789_vm6, %v3788_v1, %v4187_v6 }
 0x787   : > { %v3792_v59 = vpack.c.bf16 %v3791_v8, %v3790_v57 }
 0x789   : > { %4085 = vmatmul.mubr.msk.bf16.vlgmr.msra.gmra.mrb[16].mxu1 %vm273_vm0, %v3792_v59 }
 0x85c   : > { %v3849_v42 = vpop.f32.mrb[16].mxu1 }
 0x85d   : > { %v3850_v50 = vadd.f32 %v3998_v3, %v3849_v42  ;;  %v4086_v19 = vpop.f32.mrb[17].mxu1 }
 0x85e   : > { %v3852_v51 = vpop.f32.mrb[18].mxu1 }
 0x85f   : > { %3856 = vst.msk [vmem:[%s244_s20] sm:$0xff] %vm273_vm0, %v3850_v50  ;;  %v3853_v29 = vadd.f32 %v3998_v3, %v3852_v51  ;;  %v4087_v53 = vpop.f32.mrb[19].mxu1 }
 0x861   : > { %3857 = vst.msk [vmem:[%s244_s20 + $0x8] sm:$0xff] %vm273_vm0, %v3853_v29 }
 0x862   : > { %4319 = shalt.err (!%p4316_p2)
}
 0x863   : > { %s4320_s8 = scalar_lea.hbm %s5110_s25, 256  ;;  %s4324_s9 = scalar_lea.hbm %s5160_s4, 512 }
 0x864   : > { %p4321_p13 = scmp.ne.s32.totalorder %s5110_s25, %s4320_s8  ;;  %p4325_p4 = scmp.lt.u32.totalorder %s5110_s25, %s5160_s4 }
 0x865   : > { %p4326_p7 = scmp.lt.u32.totalorder %s4324_s9, %s4320_s8  ;;  %p4328_p11 = scmp.lt.u32.totalorder %s4320_s8, %s5110_s25 }
 0x866   : > { %p4322_p6 = pnand %p4321_p13, %p5174_p0 }
 0x867   : > { %p4327_p8 = por %p4326_p7, %p4325_p4 }
 0x868   : > { %p4323_p10 = pneg %p4322_p6 }
 0x869   : > { %p4329_p1 = por %p4328_p11, %p4327_p8 }
 0x86b   : > { %p4330_p3 = pnand %p4329_p1, %p4323_p10 }
 0x86d   : > { %4333 = shalt.err (!%p4330_p3)
}
 0x86e   : > { %s4398_s20 = smov 128   ;;  %s4399_s5 = smov 8  }
 0x86f   : > { %4098 = dma.vmem_to_hbm [thread:$0]  (%p5174_p0), %s5105_s29, 256, %s5110_s25, %s3859_s19, %s4398_s20, %s4398_s20, %s4399_s5  }
 0x870 PF: > { %s3887_s12 = sand.u32 1, %s4364_s15   ;;  %p5175_p5 = scmp.ne.s32.totalorder %s5165_s22, 0 }
 0x871   : > { %p5176_p9 = scmp.ge.s32.totalorder %s4376_s18, 2  ;;  %s3888_s24 = scalar_lea.sflag [#allocation4], %s3887_s12 }
 0x873   : > { %p4112_p12 = pnand %p5176_p9, %p5175_p5 }
 0x875   : > { %4359 = dma.done.wait (!%p4112_p12), %s3888_s24, 256  }
 0x876   : > { %4361 = vsyncadd (!%p4112_p12), %s3888_s24, 4294967040  ;;  %p18_p2 = scmp.ge.s32.totalorder %s4538_s11, 4   ;;  %s5177_s15 = smov %s4368_s16 }
 0x877   : > { %s5178_s16 = smov %s4372_s17  ;;  %s5179_s17 = smov %s4547_s14 }
 0x878   : > { %s5180_s18 = smov %s4538_s11  ;;  %20 = sbr.rel (!%p18_p2) target bundleno = 6 (0x6), region = 89 }
 0x87f   :  { %3893 = vsyncpa [#allocation3], 1 }
 0x880   :  { %3895 = vsyncpa [#allocation3 + $0x1], 1 }
 0x881   :  { %3896 = vsyncpa [#allocation6], 1 }
 0x882   :  { %3897 = vsyncpa [#allocation4], 1 }
 0x883   :  { %3899 = vsyncpa [#allocation4 + $0x1], 1 }

</bundles_post_ra>
